<compile_context>
chip_gen: v7x
topology: tpu7x:2x2x1
jax: 0.10.0
libtpu: 0.0.40
codegen_flags: <defaults>
</compile_context>

<pallas_src>
import functools
import math

import jax
import jax.numpy as jnp
from jax import lax
from jax.experimental import pallas as pl
from jax.experimental.pallas import tpu as pltpu  # noqa: F401  (TPU backend assumed)

_NEG_BIG = -1e30
_LANES = 128


# ----------------------------------------------------------------------------
# Parameter init (deterministic, nn.Linear-style uniform init)
# ----------------------------------------------------------------------------
def _init_linear(key, fan_in, fan_out):
    kw, kb = jax.random.split(key)
    bound = 1.0 / math.sqrt(fan_in)
    w = jax.random.uniform(kw, (fan_in, fan_out), jnp.float32, -bound, bound)
    b = jax.random.uniform(kb, (1, fan_out), jnp.float32, -bound, bound)
    return w, b


def init_attention_params(key, kv_in, q_in, emb):
    kq, kk, kv_, ko = jax.random.split(key, 4)
    wq, bq = _init_linear(kq, q_in, emb)
    wk, bk = _init_linear(kk, kv_in, emb)
    wv, bv = _init_linear(kv_, kv_in, emb)
    wo, bo = _init_linear(ko, emb, emb)
    return dict(wq=wq, bq=bq, wk=wk, bk=bk, wv=wv, bv=bv, wo=wo, bo=bo)


def init_cross_attention_params(key, input_size, embedding_size, query_size):
    k1, k2, k3, k4 = jax.random.split(key, 4)
    return dict(
        self1=init_attention_params(k1, input_size, input_size, embedding_size),
        self2=init_attention_params(k2, input_size, input_size, embedding_size),
        cross1=init_attention_params(k3, embedding_size,
                                     embedding_size + query_size, embedding_size),
        cross2=init_attention_params(k4, embedding_size,
                                     embedding_size + query_size, embedding_size),
    )


# ----------------------------------------------------------------------------
# Host-side (one-time) weight packing: ONE lane-padded f32 slab + static offsets.
# The 1/sqrt(head_dim) attention scale is folded into Wq / bq here.
# ----------------------------------------------------------------------------
def build_weight_slab(params, num_heads):
    E = params["self1"]["wo"].shape[0]
    hd = E // num_heads
    scale = 1.0 / math.sqrt(hd)

    entries = []

    def pack_self(tag, p):
        entries.append((tag + "_wqkv",
                        jnp.concatenate([p["wq"] * scale, p["wk"], p["wv"]], axis=1)))
        entries.append((tag + "_bqkv",
                        jnp.concatenate([p["bq"] * scale, p["bk"], p["bv"]], axis=1)))
        entries.append((tag + "_wo", p["wo"]))
        entries.append((tag + "_bo", p["bo"]))

    def pack_cross(tag, p):
        entries.append((tag + "_wkv", jnp.concatenate([p["wk"], p["wv"]], axis=1)))
        entries.append((tag + "_bkv", jnp.concatenate([p["bk"], p["bv"]], axis=1)))
        entries.append((tag + "_wq", p["wq"] * scale))
        entries.append((tag + "_bq", p["bq"] * scale))
        entries.append((tag + "_wo", p["wo"]))
        entries.append((tag + "_bo", p["bo"]))

    pack_self("s1", params["self1"])
    pack_self("s2", params["self2"])
    pack_cross("x1", params["cross1"])
    pack_cross("x2", params["cross2"])

    offsets = []
    rows = []
    r = 0
    for name, a in entries:
        nr, nc = a.shape
        assert nc <= _LANES
        pad_r = (-nr) % 8                         # 8-row alignment for clean loads
        offsets.append((name, r, nr, nc))
        rows.append(jnp.pad(a.astype(jnp.float32), ((0, pad_r), (0, _LANES - nc))))
        r += nr + pad_r
    slab = jnp.concatenate(rows, axis=0)          # (R, 128) f32
    return slab, tuple(offsets)


# ----------------------------------------------------------------------------
# Fused kernel: whole batch + all four attention stages in one invocation.
# ----------------------------------------------------------------------------
def _block_diag_bias(B, M, N):
    """(B*M, B*N) additive bias: 0 inside the same-batch block, -1e30 elsewhere."""
    rows = []
    for bi in range(B):
        blocks = []
        for bj in range(B):
            if bj == bi:
                blocks.append(jnp.zeros((M, N), jnp.float32))
            else:
                blocks.append(jnp.full((M, N), _NEG_BIG, jnp.float32))
        rows.append(blocks[0] if B == 1 else jnp.concatenate(blocks, axis=1))
    return rows[0] if B == 1 else jnp.concatenate(rows, axis=0)


def _fused_cross_attention_kernel(obs1_ref, obs2_ref, query_ref, w_ref,
                                  out_ref, *, num_heads, offsets):
    off = {name: (r, nr, nc) for name, r, nr, nc in offsets}
    B, N1, _ = obs1_ref.shape
    _, N2, _ = obs2_ref.shape
    E = off["s1_wo"][2]
    hd = E // num_heads

    def W(name):
        r0, nr, nc = off[name]
        return w_ref[r0:r0 + nr, 0:nc]            # static, 8-row-aligned slice

    def mha(q, k, v, M, N):
        """q: (B*M, E), k/v: (B*N, E) batch-stacked.  Per-batch MHA via a
        block-diagonal mask: one score matmul + one PV matmul per head for
        the WHOLE batch.  Scale is already folded into Wq."""
        bias = _block_diag_bias(B, M, N)          # hoisted out of head loop
        outs = []
        for h in range(num_heads):
            qh = q[:, h * hd:(h + 1) * hd]
            kh = k[:, h * hd:(h + 1) * hd]
            vh = v[:, h * hd:(h + 1) * hd]
            s = lax.dot_general(qh, kh, (((1,), (1,)), ((), ())),
                                preferred_element_type=jnp.float32) + bias
            s = s - jnp.max(s, axis=-1, keepdims=True)
            p = jnp.exp(s)
            p = p / jnp.sum(p, axis=-1, keepdims=True)     # exact softmax
            outs.append(jnp.dot(p, vh, preferred_element_type=jnp.float32))
        return jnp.concatenate(outs, axis=-1)     # (B*M, E)

    def self_attn(x, tag, M):
        qkv = jnp.dot(x, W(tag + "_wqkv"),
                      preferred_element_type=jnp.float32) + W(tag + "_bqkv")
        q, k, v = qkv[:, 0:E], qkv[:, E:2 * E], qkv[:, 2 * E:3 * E]
        ctx = mha(q, k, v, M, M)
        return jnp.dot(ctx, W(tag + "_wo"),
                       preferred_element_type=jnp.float32) + W(tag + "_bo")

    def cross_attn(kv_src, q_in, tag, N):
        kv = jnp.dot(kv_src, W(tag + "_wkv"),
                     preferred_element_type=jnp.float32) + W(tag + "_bkv")
        k, v = kv[:, 0:E], kv[:, E:2 * E]
        q = jnp.dot(q_in, W(tag + "_wq"),
                    preferred_element_type=jnp.float32) + W(tag + "_bq")
        ctx = mha(q, k, v, 1, N)
        return jnp.dot(ctx, W(tag + "_wo"),
                       preferred_element_type=jnp.float32) + W(tag + "_bo")

    # Batch folded into the block: stack batch along the sublane (row) axis.
    x1 = jnp.concatenate([obs1_ref[b] for b in range(B)], axis=0).astype(jnp.float32)
    x2 = jnp.concatenate([obs2_ref[b] for b in range(B)], axis=0).astype(jnp.float32)
    qv = jnp.concatenate([query_ref[b] for b in range(B)], axis=0).astype(jnp.float32)

    c1 = self_attn(x1, "s1", N1)                  # (B*N1, E)
    c2 = self_attn(x2, "s2", N2)                  # (B*N2, E)

    sum_c1 = jnp.concatenate(
        [jnp.sum(c1[b * N1:(b + 1) * N1, :], axis=0, keepdims=True)
         for b in range(B)], axis=0)              # (B, E)
    sum_c2 = jnp.concatenate(
        [jnp.sum(c2[b * N2:(b + 1) * N2, :], axis=0, keepdims=True)
         for b in range(B)], axis=0)              # (B, E)

    m1 = cross_attn(c1, jnp.concatenate([sum_c2, qv], axis=-1), "x1", N1)  # (B, E)
    m2 = cross_attn(c2, jnp.concatenate([sum_c1, qv], axis=-1), "x2", N2)  # (B, E)

    # Lane-dense packed output (4E = 128 lanes); direct sub-block stores.
    out_ref[...] = jnp.zeros_like(out_ref)
    for b in range(B):
        out_ref[b, 0:N1, 0:E] = c1[b * N1:(b + 1) * N1, :]
        out_ref[b, 0:N2, E:2 * E] = c2[b * N2:(b + 1) * N2, :]
        out_ref[b, 0:1, 2 * E:3 * E] = m1[b:b + 1, :]
        out_ref[b, 0:1, 3 * E:4 * E] = m2[b:b + 1, :]


# ----------------------------------------------------------------------------
# Forward: one gridless pallas_call for the whole CrossAttention module.
# ----------------------------------------------------------------------------
@functools.partial(jax.jit, static_argnames=("num_heads", "offsets"))
def cross_attention_forward(slab, obs1, obs2, query, *, num_heads, offsets):
    B, N1, d_in = obs1.shape
    _, N2, _ = obs2.shape
    _, _, Q = query.shape
    off = {name: (r, nr, nc) for name, r, nr, nc in offsets}
    E = off["s1_wo"][2]
    assert E % num_heads == 0, "embedding_size must be divisible by num_heads"
    nrow = max(N1, N2, 1)

    # Advisory cost estimate: this kernel is launch/latency bound, not HBM-bound.
    flops = 2 * B * (
        N1 * d_in * 3 * E + N2 * d_in * 3 * E          # self QKV projections
        + N1 * E * 2 * E + N2 * E * 2 * E              # cross KV projections
        + 2 * (E + Q) * E                              # cross Q projections
        + (N1 + N2 + 2) * E * E                        # output projections
        + 2 * (N1 * N1 + N2 * N2 + N1 + N2) * E)       # scores + PV
    trans = B * num_heads * (N1 * N1 + N2 * N2 + N1 + N2)
    bytes_acc = 4 * (obs1.size + obs2.size + query.size + slab.size
                     + B * nrow * 4 * E)

    kernel = functools.partial(_fused_cross_attention_kernel,
                               num_heads=num_heads, offsets=offsets)

    out = pl.pallas_call(
        kernel,
        out_shape=jax.ShapeDtypeStruct((B, nrow, 4 * E), jnp.float32),
        cost_estimate=pl.CostEstimate(flops=flops, transcendentals=trans,
                                      bytes_accessed=bytes_acc),
    )(obs1, obs2, query, slab)

    c1 = out[:, :N1, 0:E]
    c2 = out[:, :N2, E:2 * E]
    m1 = out[:, :1, 2 * E:3 * E]
    m2 = out[:, :1, 3 * E:4 * E]
    return ((c1, c2), (m1, m2))


# ----------------------------------------------------------------------------
# Pure-JAX reference (for correctness check) — uses the unpacked, unscaled params.
# ----------------------------------------------------------------------------
def _mha_ref(x, q_in, p, num_heads):
    q = q_in @ p["wq"] + p["bq"][0]
    k = x @ p["wk"] + p["bk"][0]
    v = x @ p["wv"] + p["bv"][0]
    B, M, E = q.shape
    N = x.shape[1]
    hd = E // num_heads
    q = q.reshape(B, M, num_heads, hd).transpose(0, 2, 1, 3)
    k = k.reshape(B, N, num_heads, hd).transpose(0, 2, 1, 3)
    v = v.reshape(B, N, num_heads, hd).transpose(0, 2, 1, 3)
    s = jnp.einsum("bhmd,bhnd->bhmn", q, k) / math.sqrt(hd)
    w = jax.nn.softmax(s, axis=-1)
    o = jnp.einsum("bhmn,bhnd->bhmd", w, v)
    o = o.transpose(0, 2, 1, 3).reshape(B, M, E)
    return o @ p["wo"] + p["bo"][0]


def _forward_ref(params, obs1, obs2, query, num_heads):
    c1 = _mha_ref(obs1, obs1, params["self1"], num_heads)
    c2 = _mha_ref(obs2, obs2, params["self2"], num_heads)
    q1 = jnp.concatenate([jnp.sum(c2, -2, keepdims=True), query], -1)
    q2 = jnp.concatenate([jnp.sum(c1, -2, keepdims=True), query], -1)
    m1 = _mha_ref(c1, q1, params["cross1"], num_heads)
    m2 = _mha_ref(c2, q2, params["cross2"], num_heads)
    return ((c1, c2), (m1, m2))


if __name__ == "__main__":
    B = 2
    N1, N2 = 6, 4          # number of entities in each observation set
    INPUT_SIZE = 8
    EMBEDDING_SIZE = 32
    QUERY_SIZE = 16
    NUM_HEADS = 4

    root = jax.random.PRNGKey(0)
    kp, k1, k2, k3 = jax.random.split(root, 4)

    params = init_cross_attention_params(kp, INPUT_SIZE, EMBEDDING_SIZE,
                                         QUERY_SIZE)
    obs1 = jax.random.normal(k1, (B, N1, INPUT_SIZE), jnp.float32)
    obs2 = jax.random.normal(k2, (B, N2, INPUT_SIZE), jnp.float32)
    query = jax.random.normal(k3, (B, 1, QUERY_SIZE), jnp.float32)

    # One-time, host-side weight packing (single slab + static offsets).
    slab, offsets = build_weight_slab(params, NUM_HEADS)

    (c1, c2), (m1, m2) = cross_attention_forward(
        slab, obs1, obs2, query, num_heads=NUM_HEADS, offsets=offsets)
    jax.block_until_ready((c1, c2, m1, m2))

    # Sanity check against the pure-JAX reference (exact softmax in the kernel;
    # reference run at highest matmul precision so both sides are ~exact f32).
    with jax.default_matmul_precision("highest"):
        (rc1, rc2), (rm1, rm2) = _forward_ref(params, obs1, obs2, query,
                                              NUM_HEADS)

    for got, ref in ((c1, rc1), (c2, rc2), (m1, rm1), (m2, rm2)):
        assert got.shape == ref.shape, "shape mismatch vs reference"
        assert jnp.allclose(got, ref, rtol=2e-3, atol=2e-3), "mismatch vs reference"

    print("KERNEL_OK")
</pallas_src>

<mosaic_0001>
module attributes {stable_mosaic.version = 11 : i64} {
  func.func @_fused_cross_attention_kernel(%arg0: memref<2x6x8xf32, #tpu.memory_space<vmem>>, %arg1: memref<2x4x8xf32, #tpu.memory_space<vmem>>, %arg2: memref<2x1x16xf32, #tpu.memory_space<vmem>>, %arg3: memref<384x128xf32, #tpu.memory_space<vmem>>, %arg4: memref<2x6x128xf32, #tpu.memory_space<vmem>>) attributes {dimension_semantics = [], scalar_prefetch = 0 : i64, scratch_operands = 0 : i64, tpu.core_type = #tpu.core_type<tc>} {
    %c0 = arith.constant 0 : index
    %c0_0 = arith.constant 0 : index
    %c0_1 = arith.constant 0 : index
    %0 = vector.load %arg0[%c0, %c0_0, %c0_1] : memref<2x6x8xf32, #tpu.memory_space<vmem>>, vector<1x6x8xf32>
    %1 = vector.shape_cast %0 : vector<1x6x8xf32> to vector<6x8xf32>
    %c1 = arith.constant 1 : index
    %c0_2 = arith.constant 0 : index
    %c0_3 = arith.constant 0 : index
    %2 = vector.load %arg0[%c1, %c0_2, %c0_3] : memref<2x6x8xf32, #tpu.memory_space<vmem>>, vector<1x6x8xf32>
    %3 = vector.shape_cast %2 : vector<1x6x8xf32> to vector<6x8xf32>
    %4 = tpu.concatenate %1, %3 in 0 : vector<6x8xf32>, vector<6x8xf32> -> vector<12x8xf32>
    %c0_4 = arith.constant 0 : index
    %c0_5 = arith.constant 0 : index
    %c0_6 = arith.constant 0 : index
    %5 = vector.load %arg1[%c0_4, %c0_5, %c0_6] : memref<2x4x8xf32, #tpu.memory_space<vmem>>, vector<1x4x8xf32>
    %6 = vector.shape_cast %5 : vector<1x4x8xf32> to vector<4x8xf32>
    %c1_7 = arith.constant 1 : index
    %c0_8 = arith.constant 0 : index
    %c0_9 = arith.constant 0 : index
    %7 = vector.load %arg1[%c1_7, %c0_8, %c0_9] : memref<2x4x8xf32, #tpu.memory_space<vmem>>, vector<1x4x8xf32>
    %8 = vector.shape_cast %7 : vector<1x4x8xf32> to vector<4x8xf32>
    %9 = tpu.concatenate %6, %8 in 0 : vector<4x8xf32>, vector<4x8xf32> -> vector<8x8xf32>
    %c0_10 = arith.constant 0 : index
    %c0_11 = arith.constant 0 : index
    %c0_12 = arith.constant 0 : index
    %10 = vector.load %arg2[%c0_10, %c0_11, %c0_12] : memref<2x1x16xf32, #tpu.memory_space<vmem>>, vector<1x1x16xf32>
    %11 = vector.shape_cast %10 : vector<1x1x16xf32> to vector<1x16xf32>
    %c1_13 = arith.constant 1 : index
    %c0_14 = arith.constant 0 : index
    %c0_15 = arith.constant 0 : index
    %12 = vector.load %arg2[%c1_13, %c0_14, %c0_15] : memref<2x1x16xf32, #tpu.memory_space<vmem>>, vector<1x1x16xf32>
    %13 = vector.shape_cast %12 : vector<1x1x16xf32> to vector<1x16xf32>
    %14 = tpu.concatenate %11, %13 in 0 : vector<1x16xf32>, vector<1x16xf32> -> vector<2x16xf32>
    %c0_16 = arith.constant 0 : index
    %c0_17 = arith.constant 0 : index
    %15 = vector.load %arg3[%c0_16, %c0_17] : memref<384x128xf32, #tpu.memory_space<vmem>>, vector<8x96xf32>
    %cst = arith.constant dense<0.000000e+00> : vector<12x96xf32>
    %16 = tpu.matmul %4, %15, %cst {dimension_numbers = #tpu.dot_dimension_numbers<[1], [0], [0], [1], [0, 0, 1, 1], [], []>} : vector<12x8xf32>, vector<8x96xf32>, vector<12x96xf32> -> vector<12x96xf32>
    %c8 = arith.constant 8 : index
    %c0_18 = arith.constant 0 : index
    %17 = vector.load %arg3[%c8, %c0_18] : memref<384x128xf32, #tpu.memory_space<vmem>>, vector<1x96xf32>
    %18 = vector.broadcast %17 : vector<1x96xf32> to vector<12x96xf32>
    %19 = arith.addf %16, %18 : vector<12x96xf32>
    %20 = vector.extract_strided_slice %19 {offsets = [0, 0], sizes = [12, 32], strides = [1, 1]} : vector<12x96xf32> to vector<12x32xf32>
    %21 = vector.extract_strided_slice %19 {offsets = [0, 32], sizes = [12, 32], strides = [1, 1]} : vector<12x96xf32> to vector<12x32xf32>
    %22 = vector.extract_strided_slice %19 {offsets = [0, 64], sizes = [12, 32], strides = [1, 1]} : vector<12x96xf32> to vector<12x32xf32>
    %cst_19 = arith.constant 0.000000e+00 : f32
    %23 = vector.broadcast %cst_19 : f32 to vector<6x6xf32>
    %cst_20 = arith.constant -1.000000e+30 : f32
    %24 = vector.broadcast %cst_20 : f32 to vector<6x6xf32>
    %25 = tpu.concatenate %23, %24 in 1 : vector<6x6xf32>, vector<6x6xf32> -> vector<6x12xf32>
    %cst_21 = arith.constant -1.000000e+30 : f32
    %26 = vector.broadcast %cst_21 : f32 to vector<6x6xf32>
    %cst_22 = arith.constant 0.000000e+00 : f32
    %27 = vector.broadcast %cst_22 : f32 to vector<6x6xf32>
    %28 = tpu.concatenate %26, %27 in 1 : vector<6x6xf32>, vector<6x6xf32> -> vector<6x12xf32>
    %29 = tpu.concatenate %25, %28 in 0 : vector<6x12xf32>, vector<6x12xf32> -> vector<12x12xf32>
    %30 = vector.extract_strided_slice %20 {offsets = [0, 0], sizes = [12, 8], strides = [1, 1]} : vector<12x32xf32> to vector<12x8xf32>
    %31 = vector.extract_strided_slice %21 {offsets = [0, 0], sizes = [12, 8], strides = [1, 1]} : vector<12x32xf32> to vector<12x8xf32>
    %32 = vector.extract_strided_slice %22 {offsets = [0, 0], sizes = [12, 8], strides = [1, 1]} : vector<12x32xf32> to vector<12x8xf32>
    %cst_23 = arith.constant dense<0.000000e+00> : vector<12x12xf32>
    %33 = tpu.matmul %30, %31, %cst_23 {dimension_numbers = #tpu.dot_dimension_numbers<[1], [1], [0], [0], [0, 0, 1, 0], [], []>} : vector<12x8xf32>, vector<12x8xf32>, vector<12x12xf32> -> vector<12x12xf32>
    %34 = arith.addf %33, %29 : vector<12x12xf32>
    %cst_24 = arith.constant dense<0xFF800000> : vector<12xf32>
    %35 = vector.multi_reduction <maximumf>, %34, %cst_24 [1] : vector<12x12xf32> to vector<12xf32>
    %36 = vector.shape_cast %35 : vector<12xf32> to vector<12x1xf32>
    %37 = vector.broadcast %36 : vector<12x1xf32> to vector<12x12xf32>
    %38 = arith.subf %34, %37 : vector<12x12xf32>
    %39 = math.exp %38 : vector<12x12xf32>
    %cst_25 = arith.constant dense<0.000000e+00> : vector<12xf32>
    %40 = vector.multi_reduction <add>, %39, %cst_25 [1] : vector<12x12xf32> to vector<12xf32>
    %41 = vector.shape_cast %40 : vector<12xf32> to vector<12x1xf32>
    %42 = vector.broadcast %41 : vector<12x1xf32> to vector<12x12xf32>
    %43 = arith.divf %39, %42 : vector<12x12xf32>
    %cst_26 = arith.constant dense<0.000000e+00> : vector<12x8xf32>
    %44 = tpu.matmul %43, %32, %cst_26 {dimension_numbers = #tpu.dot_dimension_numbers<[1], [0], [0], [1], [0, 0, 1, 1], [], []>} : vector<12x12xf32>, vector<12x8xf32>, vector<12x8xf32> -> vector<12x8xf32>
    %45 = vector.extract_strided_slice %20 {offsets = [0, 8], sizes = [12, 8], strides = [1, 1]} : vector<12x32xf32> to vector<12x8xf32>
    %46 = vector.extract_strided_slice %21 {offsets = [0, 8], sizes = [12, 8], strides = [1, 1]} : vector<12x32xf32> to vector<12x8xf32>
    %47 = vector.extract_strided_slice %22 {offsets = [0, 8], sizes = [12, 8], strides = [1, 1]} : vector<12x32xf32> to vector<12x8xf32>
    %cst_27 = arith.constant dense<0.000000e+00> : vector<12x12xf32>
    %48 = tpu.matmul %45, %46, %cst_27 {dimension_numbers = #tpu.dot_dimension_numbers<[1], [1], [0], [0], [0, 0, 1, 0], [], []>} : vector<12x8xf32>, vector<12x8xf32>, vector<12x12xf32> -> vector<12x12xf32>
    %49 = arith.addf %48, %29 : vector<12x12xf32>
    %cst_28 = arith.constant dense<0xFF800000> : vector<12xf32>
    %50 = vector.multi_reduction <maximumf>, %49, %cst_28 [1] : vector<12x12xf32> to vector<12xf32>
    %51 = vector.shape_cast %50 : vector<12xf32> to vector<12x1xf32>
    %52 = vector.broadcast %51 : vector<12x1xf32> to vector<12x12xf32>
    %53 = arith.subf %49, %52 : vector<12x12xf32>
    %54 = math.exp %53 : vector<12x12xf32>
    %cst_29 = arith.constant dense<0.000000e+00> : vector<12xf32>
    %55 = vector.multi_reduction <add>, %54, %cst_29 [1] : vector<12x12xf32> to vector<12xf32>
    %56 = vector.shape_cast %55 : vector<12xf32> to vector<12x1xf32>
    %57 = vector.broadcast %56 : vector<12x1xf32> to vector<12x12xf32>
    %58 = arith.divf %54, %57 : vector<12x12xf32>
    %cst_30 = arith.constant dense<0.000000e+00> : vector<12x8xf32>
    %59 = tpu.matmul %58, %47, %cst_30 {dimension_numbers = #tpu.dot_dimension_numbers<[1], [0], [0], [1], [0, 0, 1, 1], [], []>} : vector<12x12xf32>, vector<12x8xf32>, vector<12x8xf32> -> vector<12x8xf32>
    %60 = vector.extract_strided_slice %20 {offsets = [0, 16], sizes = [12, 8], strides = [1, 1]} : vector<12x32xf32> to vector<12x8xf32>
    %61 = vector.extract_strided_slice %21 {offsets = [0, 16], sizes = [12, 8], strides = [1, 1]} : vector<12x32xf32> to vector<12x8xf32>
    %62 = vector.extract_strided_slice %22 {offsets = [0, 16], sizes = [12, 8], strides = [1, 1]} : vector<12x32xf32> to vector<12x8xf32>
    %cst_31 = arith.constant dense<0.000000e+00> : vector<12x12xf32>
    %63 = tpu.matmul %60, %61, %cst_31 {dimension_numbers = #tpu.dot_dimension_numbers<[1], [1], [0], [0], [0, 0, 1, 0], [], []>} : vector<12x8xf32>, vector<12x8xf32>, vector<12x12xf32> -> vector<12x12xf32>
    %64 = arith.addf %63, %29 : vector<12x12xf32>
    %cst_32 = arith.constant dense<0xFF800000> : vector<12xf32>
    %65 = vector.multi_reduction <maximumf>, %64, %cst_32 [1] : vector<12x12xf32> to vector<12xf32>
    %66 = vector.shape_cast %65 : vector<12xf32> to vector<12x1xf32>
    %67 = vector.broadcast %66 : vector<12x1xf32> to vector<12x12xf32>
    %68 = arith.subf %64, %67 : vector<12x12xf32>
    %69 = math.exp %68 : vector<12x12xf32>
    %cst_33 = arith.constant dense<0.000000e+00> : vector<12xf32>
    %70 = vector.multi_reduction <add>, %69, %cst_33 [1] : vector<12x12xf32> to vector<12xf32>
    %71 = vector.shape_cast %70 : vector<12xf32> to vector<12x1xf32>
    %72 = vector.broadcast %71 : vector<12x1xf32> to vector<12x12xf32>
    %73 = arith.divf %69, %72 : vector<12x12xf32>
    %cst_34 = arith.constant dense<0.000000e+00> : vector<12x8xf32>
    %74 = tpu.matmul %73, %62, %cst_34 {dimension_numbers = #tpu.dot_dimension_numbers<[1], [0], [0], [1], [0, 0, 1, 1], [], []>} : vector<12x12xf32>, vector<12x8xf32>, vector<12x8xf32> -> vector<12x8xf32>
    %75 = vector.extract_strided_slice %20 {offsets = [0, 24], sizes = [12, 8], strides = [1, 1]} : vector<12x32xf32> to vector<12x8xf32>
    %76 = vector.extract_strided_slice %21 {offsets = [0, 24], sizes = [12, 8], strides = [1, 1]} : vector<12x32xf32> to vector<12x8xf32>
    %77 = vector.extract_strided_slice %22 {offsets = [0, 24], sizes = [12, 8], strides = [1, 1]} : vector<12x32xf32> to vector<12x8xf32>
    %cst_35 = arith.constant dense<0.000000e+00> : vector<12x12xf32>
    %78 = tpu.matmul %75, %76, %cst_35 {dimension_numbers = #tpu.dot_dimension_numbers<[1], [1], [0], [0], [0, 0, 1, 0], [], []>} : vector<12x8xf32>, vector<12x8xf32>, vector<12x12xf32> -> vector<12x12xf32>
    %79 = arith.addf %78, %29 : vector<12x12xf32>
    %cst_36 = arith.constant dense<0xFF800000> : vector<12xf32>
    %80 = vector.multi_reduction <maximumf>, %79, %cst_36 [1] : vector<12x12xf32> to vector<12xf32>
    %81 = vector.shape_cast %80 : vector<12xf32> to vector<12x1xf32>
    %82 = vector.broadcast %81 : vector<12x1xf32> to vector<12x12xf32>
    %83 = arith.subf %79, %82 : vector<12x12xf32>
    %84 = math.exp %83 : vector<12x12xf32>
    %cst_37 = arith.constant dense<0.000000e+00> : vector<12xf32>
    %85 = vector.multi_reduction <add>, %84, %cst_37 [1] : vector<12x12xf32> to vector<12xf32>
    %86 = vector.shape_cast %85 : vector<12xf32> to vector<12x1xf32>
    %87 = vector.broadcast %86 : vector<12x1xf32> to vector<12x12xf32>
    %88 = arith.divf %84, %87 : vector<12x12xf32>
    %cst_38 = arith.constant dense<0.000000e+00> : vector<12x8xf32>
    %89 = tpu.matmul %88, %77, %cst_38 {dimension_numbers = #tpu.dot_dimension_numbers<[1], [0], [0], [1], [0, 0, 1, 1], [], []>} : vector<12x12xf32>, vector<12x8xf32>, vector<12x8xf32> -> vector<12x8xf32>
    %90 = tpu.concatenate %44, %59, %74, %89 in 1 : vector<12x8xf32>, vector<12x8xf32>, vector<12x8xf32>, vector<12x8xf32> -> vector<12x32xf32>
    %c16 = arith.constant 16 : index
    %c0_39 = arith.constant 0 : index
    %91 = vector.load %arg3[%c16, %c0_39] : memref<384x128xf32, #tpu.memory_space<vmem>>, vector<32x32xf32>
    %cst_40 = arith.constant dense<0.000000e+00> : vector<12x32xf32>
    %92 = tpu.matmul %90, %91, %cst_40 {dimension_numbers = #tpu.dot_dimension_numbers<[1], [0], [0], [1], [0, 0, 1, 1], [], []>} : vector<12x32xf32>, vector<32x32xf32>, vector<12x32xf32> -> vector<12x32xf32>
    %c48 = arith.constant 48 : index
    %c0_41 = arith.constant 0 : index
    %93 = vector.load %arg3[%c48, %c0_41] : memref<384x128xf32, #tpu.memory_space<vmem>>, vector<1x32xf32>
    %94 = vector.broadcast %93 : vector<1x32xf32> to vector<12x32xf32>
    %95 = arith.addf %92, %94 : vector<12x32xf32>
    %c56 = arith.constant 56 : index
    %c0_42 = arith.constant 0 : index
    %96 = vector.load %arg3[%c56, %c0_42] : memref<384x128xf32, #tpu.memory_space<vmem>>, vector<8x96xf32>
    %cst_43 = arith.constant dense<0.000000e+00> : vector<8x96xf32>
    %97 = tpu.matmul %9, %96, %cst_43 {dimension_numbers = #tpu.dot_dimension_numbers<[1], [0], [0], [1], [0, 0, 1, 1], [], []>} : vector<8x8xf32>, vector<8x96xf32>, vector<8x96xf32> -> vector<8x96xf32>
    %c64 = arith.constant 64 : index
    %c0_44 = arith.constant 0 : index
    %98 = vector.load %arg3[%c64, %c0_44] : memref<384x128xf32, #tpu.memory_space<vmem>>, vector<1x96xf32>
    %99 = vector.broadcast %98 : vector<1x96xf32> to vector<8x96xf32>
    %100 = arith.addf %97, %99 : vector<8x96xf32>
    %101 = vector.extract_strided_slice %100 {offsets = [0, 0], sizes = [8, 32], strides = [1, 1]} : vector<8x96xf32> to vector<8x32xf32>
    %102 = vector.extract_strided_slice %100 {offsets = [0, 32], sizes = [8, 32], strides = [1, 1]} : vector<8x96xf32> to vector<8x32xf32>
    %103 = vector.extract_strided_slice %100 {offsets = [0, 64], sizes = [8, 32], strides = [1, 1]} : vector<8x96xf32> to vector<8x32xf32>
    %cst_45 = arith.constant 0.000000e+00 : f32
    %104 = vector.broadcast %cst_45 : f32 to vector<4x4xf32>
    %cst_46 = arith.constant -1.000000e+30 : f32
    %105 = vector.broadcast %cst_46 : f32 to vector<4x4xf32>
    %106 = tpu.concatenate %104, %105 in 1 : vector<4x4xf32>, vector<4x4xf32> -> vector<4x8xf32>
    %cst_47 = arith.constant -1.000000e+30 : f32
    %107 = vector.broadcast %cst_47 : f32 to vector<4x4xf32>
    %cst_48 = arith.constant 0.000000e+00 : f32
    %108 = vector.broadcast %cst_48 : f32 to vector<4x4xf32>
    %109 = tpu.concatenate %107, %108 in 1 : vector<4x4xf32>, vector<4x4xf32> -> vector<4x8xf32>
    %110 = tpu.concatenate %106, %109 in 0 : vector<4x8xf32>, vector<4x8xf32> -> vector<8x8xf32>
    %111 = vector.extract_strided_slice %101 {offsets = [0, 0], sizes = [8, 8], strides = [1, 1]} : vector<8x32xf32> to vector<8x8xf32>
    %112 = vector.extract_strided_slice %102 {offsets = [0, 0], sizes = [8, 8], strides = [1, 1]} : vector<8x32xf32> to vector<8x8xf32>
    %113 = vector.extract_strided_slice %103 {offsets = [0, 0], sizes = [8, 8], strides = [1, 1]} : vector<8x32xf32> to vector<8x8xf32>
    %cst_49 = arith.constant dense<0.000000e+00> : vector<8x8xf32>
    %114 = tpu.matmul %111, %112, %cst_49 {dimension_numbers = #tpu.dot_dimension_numbers<[1], [1], [0], [0], [0, 0, 1, 0], [], []>} : vector<8x8xf32>, vector<8x8xf32>, vector<8x8xf32> -> vector<8x8xf32>
    %115 = arith.addf %114, %110 : vector<8x8xf32>
    %cst_50 = arith.constant dense<0xFF800000> : vector<8xf32>
    %116 = vector.multi_reduction <maximumf>, %115, %cst_50 [1] : vector<8x8xf32> to vector<8xf32>
    %117 = vector.shape_cast %116 : vector<8xf32> to vector<8x1xf32>
    %118 = vector.broadcast %117 : vector<8x1xf32> to vector<8x8xf32>
    %119 = arith.subf %115, %118 : vector<8x8xf32>
    %120 = math.exp %119 : vector<8x8xf32>
    %cst_51 = arith.constant dense<0.000000e+00> : vector<8xf32>
    %121 = vector.multi_reduction <add>, %120, %cst_51 [1] : vector<8x8xf32> to vector<8xf32>
    %122 = vector.shape_cast %121 : vector<8xf32> to vector<8x1xf32>
    %123 = vector.broadcast %122 : vector<8x1xf32> to vector<8x8xf32>
    %124 = arith.divf %120, %123 : vector<8x8xf32>
    %cst_52 = arith.constant dense<0.000000e+00> : vector<8x8xf32>
    %125 = tpu.matmul %124, %113, %cst_52 {dimension_numbers = #tpu.dot_dimension_numbers<[1], [0], [0], [1], [0, 0, 1, 1], [], []>} : vector<8x8xf32>, vector<8x8xf32>, vector<8x8xf32> -> vector<8x8xf32>
    %126 = vector.extract_strided_slice %101 {offsets = [0, 8], sizes = [8, 8], strides = [1, 1]} : vector<8x32xf32> to vector<8x8xf32>
    %127 = vector.extract_strided_slice %102 {offsets = [0, 8], sizes = [8, 8], strides = [1, 1]} : vector<8x32xf32> to vector<8x8xf32>
    %128 = vector.extract_strided_slice %103 {offsets = [0, 8], sizes = [8, 8], strides = [1, 1]} : vector<8x32xf32> to vector<8x8xf32>
    %cst_53 = arith.constant dense<0.000000e+00> : vector<8x8xf32>
    %129 = tpu.matmul %126, %127, %cst_53 {dimension_numbers = #tpu.dot_dimension_numbers<[1], [1], [0], [0], [0, 0, 1, 0], [], []>} : vector<8x8xf32>, vector<8x8xf32>, vector<8x8xf32> -> vector<8x8xf32>
    %130 = arith.addf %129, %110 : vector<8x8xf32>
    %cst_54 = arith.constant dense<0xFF800000> : vector<8xf32>
    %131 = vector.multi_reduction <maximumf>, %130, %cst_54 [1] : vector<8x8xf32> to vector<8xf32>
    %132 = vector.shape_cast %131 : vector<8xf32> to vector<8x1xf32>
    %133 = vector.broadcast %132 : vector<8x1xf32> to vector<8x8xf32>
    %134 = arith.subf %130, %133 : vector<8x8xf32>
    %135 = math.exp %134 : vector<8x8xf32>
    %cst_55 = arith.constant dense<0.000000e+00> : vector<8xf32>
    %136 = vector.multi_reduction <add>, %135, %cst_55 [1] : vector<8x8xf32> to vector<8xf32>
    %137 = vector.shape_cast %136 : vector<8xf32> to vector<8x1xf32>
    %138 = vector.broadcast %137 : vector<8x1xf32> to vector<8x8xf32>
    %139 = arith.divf %135, %138 : vector<8x8xf32>
    %cst_56 = arith.constant dense<0.000000e+00> : vector<8x8xf32>
    %140 = tpu.matmul %139, %128, %cst_56 {dimension_numbers = #tpu.dot_dimension_numbers<[1], [0], [0], [1], [0, 0, 1, 1], [], []>} : vector<8x8xf32>, vector<8x8xf32>, vector<8x8xf32> -> vector<8x8xf32>
    %141 = vector.extract_strided_slice %101 {offsets = [0, 16], sizes = [8, 8], strides = [1, 1]} : vector<8x32xf32> to vector<8x8xf32>
    %142 = vector.extract_strided_slice %102 {offsets = [0, 16], sizes = [8, 8], strides = [1, 1]} : vector<8x32xf32> to vector<8x8xf32>
    %143 = vector.extract_strided_slice %103 {offsets = [0, 16], sizes = [8, 8], strides = [1, 1]} : vector<8x32xf32> to vector<8x8xf32>
    %cst_57 = arith.constant dense<0.000000e+00> : vector<8x8xf32>
    %144 = tpu.matmul %141, %142, %cst_57 {dimension_numbers = #tpu.dot_dimension_numbers<[1], [1], [0], [0], [0, 0, 1, 0], [], []>} : vector<8x8xf32>, vector<8x8xf32>, vector<8x8xf32> -> vector<8x8xf32>
    %145 = arith.addf %144, %110 : vector<8x8xf32>
    %cst_58 = arith.constant dense<0xFF800000> : vector<8xf32>
    %146 = vector.multi_reduction <maximumf>, %145, %cst_58 [1] : vector<8x8xf32> to vector<8xf32>
    %147 = vector.shape_cast %146 : vector<8xf32> to vector<8x1xf32>
    %148 = vector.broadcast %147 : vector<8x1xf32> to vector<8x8xf32>
    %149 = arith.subf %145, %148 : vector<8x8xf32>
    %150 = math.exp %149 : vector<8x8xf32>
    %cst_59 = arith.constant dense<0.000000e+00> : vector<8xf32>
    %151 = vector.multi_reduction <add>, %150, %cst_59 [1] : vector<8x8xf32> to vector<8xf32>
    %152 = vector.shape_cast %151 : vector<8xf32> to vector<8x1xf32>
    %153 = vector.broadcast %152 : vector<8x1xf32> to vector<8x8xf32>
    %154 = arith.divf %150, %153 : vector<8x8xf32>
    %cst_60 = arith.constant dense<0.000000e+00> : vector<8x8xf32>
    %155 = tpu.matmul %154, %143, %cst_60 {dimension_numbers = #tpu.dot_dimension_numbers<[1], [0], [0], [1], [0, 0, 1, 1], [], []>} : vector<8x8xf32>, vector<8x8xf32>, vector<8x8xf32> -> vector<8x8xf32>
    %156 = vector.extract_strided_slice %101 {offsets = [0, 24], sizes = [8, 8], strides = [1, 1]} : vector<8x32xf32> to vector<8x8xf32>
    %157 = vector.extract_strided_slice %102 {offsets = [0, 24], sizes = [8, 8], strides = [1, 1]} : vector<8x32xf32> to vector<8x8xf32>
    %158 = vector.extract_strided_slice %103 {offsets = [0, 24], sizes = [8, 8], strides = [1, 1]} : vector<8x32xf32> to vector<8x8xf32>
    %cst_61 = arith.constant dense<0.000000e+00> : vector<8x8xf32>
    %159 = tpu.matmul %156, %157, %cst_61 {dimension_numbers = #tpu.dot_dimension_numbers<[1], [1], [0], [0], [0, 0, 1, 0], [], []>} : vector<8x8xf32>, vector<8x8xf32>, vector<8x8xf32> -> vector<8x8xf32>
    %160 = arith.addf %159, %110 : vector<8x8xf32>
    %cst_62 = arith.constant dense<0xFF800000> : vector<8xf32>
    %161 = vector.multi_reduction <maximumf>, %160, %cst_62 [1] : vector<8x8xf32> to vector<8xf32>
    %162 = vector.shape_cast %161 : vector<8xf32> to vector<8x1xf32>
    %163 = vector.broadcast %162 : vector<8x1xf32> to vector<8x8xf32>
    %164 = arith.subf %160, %163 : vector<8x8xf32>
    %165 = math.exp %164 : vector<8x8xf32>
    %cst_63 = arith.constant dense<0.000000e+00> : vector<8xf32>
    %166 = vector.multi_reduction <add>, %165, %cst_63 [1] : vector<8x8xf32> to vector<8xf32>
    %167 = vector.shape_cast %166 : vector<8xf32> to vector<8x1xf32>
    %168 = vector.broadcast %167 : vector<8x1xf32> to vector<8x8xf32>
    %169 = arith.divf %165, %168 : vector<8x8xf32>
    %cst_64 = arith.constant dense<0.000000e+00> : vector<8x8xf32>
    %170 = tpu.matmul %169, %158, %cst_64 {dimension_numbers = #tpu.dot_dimension_numbers<[1], [0], [0], [1], [0, 0, 1, 1], [], []>} : vector<8x8xf32>, vector<8x8xf32>, vector<8x8xf32> -> vector<8x8xf32>
    %171 = tpu.concatenate %125, %140, %155, %170 in 1 : vector<8x8xf32>, vector<8x8xf32>, vector<8x8xf32>, vector<8x8xf32> -> vector<8x32xf32>
    %c72 = arith.constant 72 : index
    %c0_65 = arith.constant 0 : index
    %172 = vector.load %arg3[%c72, %c0_65] : memref<384x128xf32, #tpu.memory_space<vmem>>, vector<32x32xf32>
    %cst_66 = arith.constant dense<0.000000e+00> : vector<8x32xf32>
    %173 = tpu.matmul %171, %172, %cst_66 {dimension_numbers = #tpu.dot_dimension_numbers<[1], [0], [0], [1], [0, 0, 1, 1], [], []>} : vector<8x32xf32>, vector<32x32xf32>, vector<8x32xf32> -> vector<8x32xf32>
    %c104 = arith.constant 104 : index
    %c0_67 = arith.constant 0 : index
    %174 = vector.load %arg3[%c104, %c0_67] : memref<384x128xf32, #tpu.memory_space<vmem>>, vector<1x32xf32>
    %175 = vector.broadcast %174 : vector<1x32xf32> to vector<8x32xf32>
    %176 = arith.addf %173, %175 : vector<8x32xf32>
    %177 = vector.extract_strided_slice %95 {offsets = [0, 0], sizes = [6, 32], strides = [1, 1]} : vector<12x32xf32> to vector<6x32xf32>
    %cst_68 = arith.constant dense<0.000000e+00> : vector<32xf32>
    %178 = vector.multi_reduction <add>, %177, %cst_68 [0] : vector<6x32xf32> to vector<32xf32>
    %179 = vector.shape_cast %178 : vector<32xf32> to vector<1x32xf32>
    %180 = vector.extract_strided_slice %95 {offsets = [6, 0], sizes = [6, 32], strides = [1, 1]} : vector<12x32xf32> to vector<6x32xf32>
    %cst_69 = arith.constant dense<0.000000e+00> : vector<32xf32>
    %181 = vector.multi_reduction <add>, %180, %cst_69 [0] : vector<6x32xf32> to vector<32xf32>
    %182 = vector.shape_cast %181 : vector<32xf32> to vector<1x32xf32>
    %183 = tpu.concatenate %179, %182 in 0 : vector<1x32xf32>, vector<1x32xf32> -> vector<2x32xf32>
    %184 = vector.extract_strided_slice %176 {offsets = [0, 0], sizes = [4, 32], strides = [1, 1]} : vector<8x32xf32> to vector<4x32xf32>
    %cst_70 = arith.constant dense<0.000000e+00> : vector<32xf32>
    %185 = vector.multi_reduction <add>, %184, %cst_70 [0] : vector<4x32xf32> to vector<32xf32>
    %186 = vector.shape_cast %185 : vector<32xf32> to vector<1x32xf32>
    %187 = vector.extract_strided_slice %176 {offsets = [4, 0], sizes = [4, 32], strides = [1, 1]} : vector<8x32xf32> to vector<4x32xf32>
    %cst_71 = arith.constant dense<0.000000e+00> : vector<32xf32>
    %188 = vector.multi_reduction <add>, %187, %cst_71 [0] : vector<4x32xf32> to vector<32xf32>
    %189 = vector.shape_cast %188 : vector<32xf32> to vector<1x32xf32>
    %190 = tpu.concatenate %186, %189 in 0 : vector<1x32xf32>, vector<1x32xf32> -> vector<2x32xf32>
    %191 = tpu.concatenate %190, %14 in 1 : vector<2x32xf32>, vector<2x16xf32> -> vector<2x48xf32>
    %c112 = arith.constant 112 : index
    %c0_72 = arith.constant 0 : index
    %192 = vector.load %arg3[%c112, %c0_72] : memref<384x128xf32, #tpu.memory_space<vmem>>, vector<32x64xf32>
    %cst_73 = arith.constant dense<0.000000e+00> : vector<12x64xf32>
    %193 = tpu.matmul %95, %192, %cst_73 {dimension_numbers = #tpu.dot_dimension_numbers<[1], [0], [0], [1], [0, 0, 1, 1], [], []>} : vector<12x32xf32>, vector<32x64xf32>, vector<12x64xf32> -> vector<12x64xf32>
    %c144 = arith.constant 144 : index
    %c0_74 = arith.constant 0 : index
    %194 = vector.load %arg3[%c144, %c0_74] : memref<384x128xf32, #tpu.memory_space<vmem>>, vector<1x64xf32>
    %195 = vector.broadcast %194 : vector<1x64xf32> to vector<12x64xf32>
    %196 = arith.addf %193, %195 : vector<12x64xf32>
    %197 = vector.extract_strided_slice %196 {offsets = [0, 0], sizes = [12, 32], strides = [1, 1]} : vector<12x64xf32> to vector<12x32xf32>
    %198 = vector.extract_strided_slice %196 {offsets = [0, 32], sizes = [12, 32], strides = [1, 1]} : vector<12x64xf32> to vector<12x32xf32>
    %c152 = arith.constant 152 : index
    %c0_75 = arith.constant 0 : index
    %199 = vector.load %arg3[%c152, %c0_75] : memref<384x128xf32, #tpu.memory_space<vmem>>, vector<48x32xf32>
    %cst_76 = arith.constant dense<0.000000e+00> : vector<2x32xf32>
    %200 = tpu.matmul %191, %199, %cst_76 {dimension_numbers = #tpu.dot_dimension_numbers<[1], [0], [0], [1], [0, 0, 1, 1], [], []>} : vector<2x48xf32>, vector<48x32xf32>, vector<2x32xf32> -> vector<2x32xf32>
    %c200 = arith.constant 200 : index
    %c0_77 = arith.constant 0 : index
    %201 = vector.load %arg3[%c200, %c0_77] : memref<384x128xf32, #tpu.memory_space<vmem>>, vector<1x32xf32>
    %202 = vector.broadcast %201 : vector<1x32xf32> to vector<2x32xf32>
    %203 = arith.addf %200, %202 : vector<2x32xf32>
    %cst_78 = arith.constant 0.000000e+00 : f32
    %204 = vector.broadcast %cst_78 : f32 to vector<1x6xf32>
    %cst_79 = arith.constant -1.000000e+30 : f32
    %205 = vector.broadcast %cst_79 : f32 to vector<1x6xf32>
    %206 = tpu.concatenate %204, %205 in 1 : vector<1x6xf32>, vector<1x6xf32> -> vector<1x12xf32>
    %cst_80 = arith.constant -1.000000e+30 : f32
    %207 = vector.broadcast %cst_80 : f32 to vector<1x6xf32>
    %cst_81 = arith.constant 0.000000e+00 : f32
    %208 = vector.broadcast %cst_81 : f32 to vector<1x6xf32>
    %209 = tpu.concatenate %207, %208 in 1 : vector<1x6xf32>, vector<1x6xf32> -> vector<1x12xf32>
    %210 = tpu.concatenate %206, %209 in 0 : vector<1x12xf32>, vector<1x12xf32> -> vector<2x12xf32>
    %211 = vector.extract_strided_slice %203 {offsets = [0, 0], sizes = [2, 8], strides = [1, 1]} : vector<2x32xf32> to vector<2x8xf32>
    %212 = vector.extract_strided_slice %197 {offsets = [0, 0], sizes = [12, 8], strides = [1, 1]} : vector<12x32xf32> to vector<12x8xf32>
    %213 = vector.extract_strided_slice %198 {offsets = [0, 0], sizes = [12, 8], strides = [1, 1]} : vector<12x32xf32> to vector<12x8xf32>
    %cst_82 = arith.constant dense<0.000000e+00> : vector<2x12xf32>
    %214 = tpu.matmul %211, %212, %cst_82 {dimension_numbers = #tpu.dot_dimension_numbers<[1], [1], [0], [0], [0, 0, 1, 0], [], []>} : vector<2x8xf32>, vector<12x8xf32>, vector<2x12xf32> -> vector<2x12xf32>
    %215 = arith.addf %214, %210 : vector<2x12xf32>
    %cst_83 = arith.constant dense<0xFF800000> : vector<2xf32>
    %216 = vector.multi_reduction <maximumf>, %215, %cst_83 [1] : vector<2x12xf32> to vector<2xf32>
    %217 = vector.shape_cast %216 : vector<2xf32> to vector<2x1xf32>
    %218 = vector.broadcast %217 : vector<2x1xf32> to vector<2x12xf32>
    %219 = arith.subf %215, %218 : vector<2x12xf32>
    %220 = math.exp %219 : vector<2x12xf32>
    %cst_84 = arith.constant dense<0.000000e+00> : vector<2xf32>
    %221 = vector.multi_reduction <add>, %220, %cst_84 [1] : vector<2x12xf32> to vector<2xf32>
    %222 = vector.shape_cast %221 : vector<2xf32> to vector<2x1xf32>
    %223 = vector.broadcast %222 : vector<2x1xf32> to vector<2x12xf32>
    %224 = arith.divf %220, %223 : vector<2x12xf32>
    %cst_85 = arith.constant dense<0.000000e+00> : vector<2x8xf32>
    %225 = tpu.matmul %224, %213, %cst_85 {dimension_numbers = #tpu.dot_dimension_numbers<[1], [0], [0], [1], [0, 0, 1, 1], [], []>} : vector<2x12xf32>, vector<12x8xf32>, vector<2x8xf32> -> vector<2x8xf32>
    %226 = vector.extract_strided_slice %203 {offsets = [0, 8], sizes = [2, 8], strides = [1, 1]} : vector<2x32xf32> to vector<2x8xf32>
    %227 = vector.extract_strided_slice %197 {offsets = [0, 8], sizes = [12, 8], strides = [1, 1]} : vector<12x32xf32> to vector<12x8xf32>
    %228 = vector.extract_strided_slice %198 {offsets = [0, 8], sizes = [12, 8], strides = [1, 1]} : vector<12x32xf32> to vector<12x8xf32>
    %cst_86 = arith.constant dense<0.000000e+00> : vector<2x12xf32>
    %229 = tpu.matmul %226, %227, %cst_86 {dimension_numbers = #tpu.dot_dimension_numbers<[1], [1], [0], [0], [0, 0, 1, 0], [], []>} : vector<2x8xf32>, vector<12x8xf32>, vector<2x12xf32> -> vector<2x12xf32>
    %230 = arith.addf %229, %210 : vector<2x12xf32>
    %cst_87 = arith.constant dense<0xFF800000> : vector<2xf32>
    %231 = vector.multi_reduction <maximumf>, %230, %cst_87 [1] : vector<2x12xf32> to vector<2xf32>
    %232 = vector.shape_cast %231 : vector<2xf32> to vector<2x1xf32>
    %233 = vector.broadcast %232 : vector<2x1xf32> to vector<2x12xf32>
    %234 = arith.subf %230, %233 : vector<2x12xf32>
    %235 = math.exp %234 : vector<2x12xf32>
    %cst_88 = arith.constant dense<0.000000e+00> : vector<2xf32>
    %236 = vector.multi_reduction <add>, %235, %cst_88 [1] : vector<2x12xf32> to vector<2xf32>
    %237 = vector.shape_cast %236 : vector<2xf32> to vector<2x1xf32>
    %238 = vector.broadcast %237 : vector<2x1xf32> to vector<2x12xf32>
    %239 = arith.divf %235, %238 : vector<2x12xf32>
    %cst_89 = arith.constant dense<0.000000e+00> : vector<2x8xf32>
    %240 = tpu.matmul %239, %228, %cst_89 {dimension_numbers = #tpu.dot_dimension_numbers<[1], [0], [0], [1], [0, 0, 1, 1], [], []>} : vector<2x12xf32>, vector<12x8xf32>, vector<2x8xf32> -> vector<2x8xf32>
    %241 = vector.extract_strided_slice %203 {offsets = [0, 16], sizes = [2, 8], strides = [1, 1]} : vector<2x32xf32> to vector<2x8xf32>
    %242 = vector.extract_strided_slice %197 {offsets = [0, 16], sizes = [12, 8], strides = [1, 1]} : vector<12x32xf32> to vector<12x8xf32>
    %243 = vector.extract_strided_slice %198 {offsets = [0, 16], sizes = [12, 8], strides = [1, 1]} : vector<12x32xf32> to vector<12x8xf32>
    %cst_90 = arith.constant dense<0.000000e+00> : vector<2x12xf32>
    %244 = tpu.matmul %241, %242, %cst_90 {dimension_numbers = #tpu.dot_dimension_numbers<[1], [1], [0], [0], [0, 0, 1, 0], [], []>} : vector<2x8xf32>, vector<12x8xf32>, vector<2x12xf32> -> vector<2x12xf32>
    %245 = arith.addf %244, %210 : vector<2x12xf32>
    %cst_91 = arith.constant dense<0xFF800000> : vector<2xf32>
    %246 = vector.multi_reduction <maximumf>, %245, %cst_91 [1] : vector<2x12xf32> to vector<2xf32>
    %247 = vector.shape_cast %246 : vector<2xf32> to vector<2x1xf32>
    %248 = vector.broadcast %247 : vector<2x1xf32> to vector<2x12xf32>
    %249 = arith.subf %245, %248 : vector<2x12xf32>
    %250 = math.exp %249 : vector<2x12xf32>
    %cst_92 = arith.constant dense<0.000000e+00> : vector<2xf32>
    %251 = vector.multi_reduction <add>, %250, %cst_92 [1] : vector<2x12xf32> to vector<2xf32>
    %252 = vector.shape_cast %251 : vector<2xf32> to vector<2x1xf32>
    %253 = vector.broadcast %252 : vector<2x1xf32> to vector<2x12xf32>
    %254 = arith.divf %250, %253 : vector<2x12xf32>
    %cst_93 = arith.constant dense<0.000000e+00> : vector<2x8xf32>
    %255 = tpu.matmul %254, %243, %cst_93 {dimension_numbers = #tpu.dot_dimension_numbers<[1], [0], [0], [1], [0, 0, 1, 1], [], []>} : vector<2x12xf32>, vector<12x8xf32>, vector<2x8xf32> -> vector<2x8xf32>
    %256 = vector.extract_strided_slice %203 {offsets = [0, 24], sizes = [2, 8], strides = [1, 1]} : vector<2x32xf32> to vector<2x8xf32>
    %257 = vector.extract_strided_slice %197 {offsets = [0, 24], sizes = [12, 8], strides = [1, 1]} : vector<12x32xf32> to vector<12x8xf32>
    %258 = vector.extract_strided_slice %198 {offsets = [0, 24], sizes = [12, 8], strides = [1, 1]} : vector<12x32xf32> to vector<12x8xf32>
    %cst_94 = arith.constant dense<0.000000e+00> : vector<2x12xf32>
    %259 = tpu.matmul %256, %257, %cst_94 {dimension_numbers = #tpu.dot_dimension_numbers<[1], [1], [0], [0], [0, 0, 1, 0], [], []>} : vector<2x8xf32>, vector<12x8xf32>, vector<2x12xf32> -> vector<2x12xf32>
    %260 = arith.addf %259, %210 : vector<2x12xf32>
    %cst_95 = arith.constant dense<0xFF800000> : vector<2xf32>
    %261 = vector.multi_reduction <maximumf>, %260, %cst_95 [1] : vector<2x12xf32> to vector<2xf32>
    %262 = vector.shape_cast %261 : vector<2xf32> to vector<2x1xf32>
    %263 = vector.broadcast %262 : vector<2x1xf32> to vector<2x12xf32>
    %264 = arith.subf %260, %263 : vector<2x12xf32>
    %265 = math.exp %264 : vector<2x12xf32>
    %cst_96 = arith.constant dense<0.000000e+00> : vector<2xf32>
    %266 = vector.multi_reduction <add>, %265, %cst_96 [1] : vector<2x12xf32> to vector<2xf32>
    %267 = vector.shape_cast %266 : vector<2xf32> to vector<2x1xf32>
    %268 = vector.broadcast %267 : vector<2x1xf32> to vector<2x12xf32>
    %269 = arith.divf %265, %268 : vector<2x12xf32>
    %cst_97 = arith.constant dense<0.000000e+00> : vector<2x8xf32>
    %270 = tpu.matmul %269, %258, %cst_97 {dimension_numbers = #tpu.dot_dimension_numbers<[1], [0], [0], [1], [0, 0, 1, 1], [], []>} : vector<2x12xf32>, vector<12x8xf32>, vector<2x8xf32> -> vector<2x8xf32>
    %271 = tpu.concatenate %225, %240, %255, %270 in 1 : vector<2x8xf32>, vector<2x8xf32>, vector<2x8xf32>, vector<2x8xf32> -> vector<2x32xf32>
    %c208 = arith.constant 208 : index
    %c0_98 = arith.constant 0 : index
    %272 = vector.load %arg3[%c208, %c0_98] : memref<384x128xf32, #tpu.memory_space<vmem>>, vector<32x32xf32>
    %cst_99 = arith.constant dense<0.000000e+00> : vector<2x32xf32>
    %273 = tpu.matmul %271, %272, %cst_99 {dimension_numbers = #tpu.dot_dimension_numbers<[1], [0], [0], [1], [0, 0, 1, 1], [], []>} : vector<2x32xf32>, vector<32x32xf32>, vector<2x32xf32> -> vector<2x32xf32>
    %c240 = arith.constant 240 : index
    %c0_100 = arith.constant 0 : index
    %274 = vector.load %arg3[%c240, %c0_100] : memref<384x128xf32, #tpu.memory_space<vmem>>, vector<1x32xf32>
    %275 = vector.broadcast %274 : vector<1x32xf32> to vector<2x32xf32>
    %276 = arith.addf %273, %275 : vector<2x32xf32>
    %277 = tpu.concatenate %183, %14 in 1 : vector<2x32xf32>, vector<2x16xf32> -> vector<2x48xf32>
    %c248 = arith.constant 248 : index
    %c0_101 = arith.constant 0 : index
    %278 = vector.load %arg3[%c248, %c0_101] : memref<384x128xf32, #tpu.memory_space<vmem>>, vector<32x64xf32>
    %cst_102 = arith.constant dense<0.000000e+00> : vector<8x64xf32>
    %279 = tpu.matmul %176, %278, %cst_102 {dimension_numbers = #tpu.dot_dimension_numbers<[1], [0], [0], [1], [0, 0, 1, 1], [], []>} : vector<8x32xf32>, vector<32x64xf32>, vector<8x64xf32> -> vector<8x64xf32>
    %c280 = arith.constant 280 : index
    %c0_103 = arith.constant 0 : index
    %280 = vector.load %arg3[%c280, %c0_103] : memref<384x128xf32, #tpu.memory_space<vmem>>, vector<1x64xf32>
    %281 = vector.broadcast %280 : vector<1x64xf32> to vector<8x64xf32>
    %282 = arith.addf %279, %281 : vector<8x64xf32>
    %283 = vector.extract_strided_slice %282 {offsets = [0, 0], sizes = [8, 32], strides = [1, 1]} : vector<8x64xf32> to vector<8x32xf32>
    %284 = vector.extract_strided_slice %282 {offsets = [0, 32], sizes = [8, 32], strides = [1, 1]} : vector<8x64xf32> to vector<8x32xf32>
    %c288 = arith.constant 288 : index
    %c0_104 = arith.constant 0 : index
    %285 = vector.load %arg3[%c288, %c0_104] : memref<384x128xf32, #tpu.memory_space<vmem>>, vector<48x32xf32>
    %cst_105 = arith.constant dense<0.000000e+00> : vector<2x32xf32>
    %286 = tpu.matmul %277, %285, %cst_105 {dimension_numbers = #tpu.dot_dimension_numbers<[1], [0], [0], [1], [0, 0, 1, 1], [], []>} : vector<2x48xf32>, vector<48x32xf32>, vector<2x32xf32> -> vector<2x32xf32>
    %c336 = arith.constant 336 : index
    %c0_106 = arith.constant 0 : index
    %287 = vector.load %arg3[%c336, %c0_106] : memref<384x128xf32, #tpu.memory_space<vmem>>, vector<1x32xf32>
    %288 = vector.broadcast %287 : vector<1x32xf32> to vector<2x32xf32>
    %289 = arith.addf %286, %288 : vector<2x32xf32>
    %cst_107 = arith.constant 0.000000e+00 : f32
    %290 = vector.broadcast %cst_107 : f32 to vector<1x4xf32>
    %cst_108 = arith.constant -1.000000e+30 : f32
    %291 = vector.broadcast %cst_108 : f32 to vector<1x4xf32>
    %292 = tpu.concatenate %290, %291 in 1 : vector<1x4xf32>, vector<1x4xf32> -> vector<1x8xf32>
    %cst_109 = arith.constant -1.000000e+30 : f32
    %293 = vector.broadcast %cst_109 : f32 to vector<1x4xf32>
    %cst_110 = arith.constant 0.000000e+00 : f32
    %294 = vector.broadcast %cst_110 : f32 to vector<1x4xf32>
    %295 = tpu.concatenate %293, %294 in 1 : vector<1x4xf32>, vector<1x4xf32> -> vector<1x8xf32>
    %296 = tpu.concatenate %292, %295 in 0 : vector<1x8xf32>, vector<1x8xf32> -> vector<2x8xf32>
    %297 = vector.extract_strided_slice %289 {offsets = [0, 0], sizes = [2, 8], strides = [1, 1]} : vector<2x32xf32> to vector<2x8xf32>
    %298 = vector.extract_strided_slice %283 {offsets = [0, 0], sizes = [8, 8], strides = [1, 1]} : vector<8x32xf32> to vector<8x8xf32>
    %299 = vector.extract_strided_slice %284 {offsets = [0, 0], sizes = [8, 8], strides = [1, 1]} : vector<8x32xf32> to vector<8x8xf32>
    %cst_111 = arith.constant dense<0.000000e+00> : vector<2x8xf32>
    %300 = tpu.matmul %297, %298, %cst_111 {dimension_numbers = #tpu.dot_dimension_numbers<[1], [1], [0], [0], [0, 0, 1, 0], [], []>} : vector<2x8xf32>, vector<8x8xf32>, vector<2x8xf32> -> vector<2x8xf32>
    %301 = arith.addf %300, %296 : vector<2x8xf32>
    %cst_112 = arith.constant dense<0xFF800000> : vector<2xf32>
    %302 = vector.multi_reduction <maximumf>, %301, %cst_112 [1] : vector<2x8xf32> to vector<2xf32>
    %303 = vector.shape_cast %302 : vector<2xf32> to vector<2x1xf32>
    %304 = vector.broadcast %303 : vector<2x1xf32> to vector<2x8xf32>
    %305 = arith.subf %301, %304 : vector<2x8xf32>
    %306 = math.exp %305 : vector<2x8xf32>
    %cst_113 = arith.constant dense<0.000000e+00> : vector<2xf32>
    %307 = vector.multi_reduction <add>, %306, %cst_113 [1] : vector<2x8xf32> to vector<2xf32>
    %308 = vector.shape_cast %307 : vector<2xf32> to vector<2x1xf32>
    %309 = vector.broadcast %308 : vector<2x1xf32> to vector<2x8xf32>
    %310 = arith.divf %306, %309 : vector<2x8xf32>
    %cst_114 = arith.constant dense<0.000000e+00> : vector<2x8xf32>
    %311 = tpu.matmul %310, %299, %cst_114 {dimension_numbers = #tpu.dot_dimension_numbers<[1], [0], [0], [1], [0, 0, 1, 1], [], []>} : vector<2x8xf32>, vector<8x8xf32>, vector<2x8xf32> -> vector<2x8xf32>
    %312 = vector.extract_strided_slice %289 {offsets = [0, 8], sizes = [2, 8], strides = [1, 1]} : vector<2x32xf32> to vector<2x8xf32>
    %313 = vector.extract_strided_slice %283 {offsets = [0, 8], sizes = [8, 8], strides = [1, 1]} : vector<8x32xf32> to vector<8x8xf32>
    %314 = vector.extract_strided_slice %284 {offsets = [0, 8], sizes = [8, 8], strides = [1, 1]} : vector<8x32xf32> to vector<8x8xf32>
    %cst_115 = arith.constant dense<0.000000e+00> : vector<2x8xf32>
    %315 = tpu.matmul %312, %313, %cst_115 {dimension_numbers = #tpu.dot_dimension_numbers<[1], [1], [0], [0], [0, 0, 1, 0], [], []>} : vector<2x8xf32>, vector<8x8xf32>, vector<2x8xf32> -> vector<2x8xf32>
    %316 = arith.addf %315, %296 : vector<2x8xf32>
    %cst_116 = arith.constant dense<0xFF800000> : vector<2xf32>
    %317 = vector.multi_reduction <maximumf>, %316, %cst_116 [1] : vector<2x8xf32> to vector<2xf32>
    %318 = vector.shape_cast %317 : vector<2xf32> to vector<2x1xf32>
    %319 = vector.broadcast %318 : vector<2x1xf32> to vector<2x8xf32>
    %320 = arith.subf %316, %319 : vector<2x8xf32>
    %321 = math.exp %320 : vector<2x8xf32>
    %cst_117 = arith.constant dense<0.000000e+00> : vector<2xf32>
    %322 = vector.multi_reduction <add>, %321, %cst_117 [1] : vector<2x8xf32> to vector<2xf32>
    %323 = vector.shape_cast %322 : vector<2xf32> to vector<2x1xf32>
    %324 = vector.broadcast %323 : vector<2x1xf32> to vector<2x8xf32>
    %325 = arith.divf %321, %324 : vector<2x8xf32>
    %cst_118 = arith.constant dense<0.000000e+00> : vector<2x8xf32>
    %326 = tpu.matmul %325, %314, %cst_118 {dimension_numbers = #tpu.dot_dimension_numbers<[1], [0], [0], [1], [0, 0, 1, 1], [], []>} : vector<2x8xf32>, vector<8x8xf32>, vector<2x8xf32> -> vector<2x8xf32>
    %327 = vector.extract_strided_slice %289 {offsets = [0, 16], sizes = [2, 8], strides = [1, 1]} : vector<2x32xf32> to vector<2x8xf32>
    %328 = vector.extract_strided_slice %283 {offsets = [0, 16], sizes = [8, 8], strides = [1, 1]} : vector<8x32xf32> to vector<8x8xf32>
    %329 = vector.extract_strided_slice %284 {offsets = [0, 16], sizes = [8, 8], strides = [1, 1]} : vector<8x32xf32> to vector<8x8xf32>
    %cst_119 = arith.constant dense<0.000000e+00> : vector<2x8xf32>
    %330 = tpu.matmul %327, %328, %cst_119 {dimension_numbers = #tpu.dot_dimension_numbers<[1], [1], [0], [0], [0, 0, 1, 0], [], []>} : vector<2x8xf32>, vector<8x8xf32>, vector<2x8xf32> -> vector<2x8xf32>
    %331 = arith.addf %330, %296 : vector<2x8xf32>
    %cst_120 = arith.constant dense<0xFF800000> : vector<2xf32>
    %332 = vector.multi_reduction <maximumf>, %331, %cst_120 [1] : vector<2x8xf32> to vector<2xf32>
    %333 = vector.shape_cast %332 : vector<2xf32> to vector<2x1xf32>
    %334 = vector.broadcast %333 : vector<2x1xf32> to vector<2x8xf32>
    %335 = arith.subf %331, %334 : vector<2x8xf32>
    %336 = math.exp %335 : vector<2x8xf32>
    %cst_121 = arith.constant dense<0.000000e+00> : vector<2xf32>
    %337 = vector.multi_reduction <add>, %336, %cst_121 [1] : vector<2x8xf32> to vector<2xf32>
    %338 = vector.shape_cast %337 : vector<2xf32> to vector<2x1xf32>
    %339 = vector.broadcast %338 : vector<2x1xf32> to vector<2x8xf32>
    %340 = arith.divf %336, %339 : vector<2x8xf32>
    %cst_122 = arith.constant dense<0.000000e+00> : vector<2x8xf32>
    %341 = tpu.matmul %340, %329, %cst_122 {dimension_numbers = #tpu.dot_dimension_numbers<[1], [0], [0], [1], [0, 0, 1, 1], [], []>} : vector<2x8xf32>, vector<8x8xf32>, vector<2x8xf32> -> vector<2x8xf32>
    %342 = vector.extract_strided_slice %289 {offsets = [0, 24], sizes = [2, 8], strides = [1, 1]} : vector<2x32xf32> to vector<2x8xf32>
    %343 = vector.extract_strided_slice %283 {offsets = [0, 24], sizes = [8, 8], strides = [1, 1]} : vector<8x32xf32> to vector<8x8xf32>
    %344 = vector.extract_strided_slice %284 {offsets = [0, 24], sizes = [8, 8], strides = [1, 1]} : vector<8x32xf32> to vector<8x8xf32>
    %cst_123 = arith.constant dense<0.000000e+00> : vector<2x8xf32>
    %345 = tpu.matmul %342, %343, %cst_123 {dimension_numbers = #tpu.dot_dimension_numbers<[1], [1], [0], [0], [0, 0, 1, 0], [], []>} : vector<2x8xf32>, vector<8x8xf32>, vector<2x8xf32> -> vector<2x8xf32>
    %346 = arith.addf %345, %296 : vector<2x8xf32>
    %cst_124 = arith.constant dense<0xFF800000> : vector<2xf32>
    %347 = vector.multi_reduction <maximumf>, %346, %cst_124 [1] : vector<2x8xf32> to vector<2xf32>
    %348 = vector.shape_cast %347 : vector<2xf32> to vector<2x1xf32>
    %349 = vector.broadcast %348 : vector<2x1xf32> to vector<2x8xf32>
    %350 = arith.subf %346, %349 : vector<2x8xf32>
    %351 = math.exp %350 : vector<2x8xf32>
    %cst_125 = arith.constant dense<0.000000e+00> : vector<2xf32>
    %352 = vector.multi_reduction <add>, %351, %cst_125 [1] : vector<2x8xf32> to vector<2xf32>
    %353 = vector.shape_cast %352 : vector<2xf32> to vector<2x1xf32>
    %354 = vector.broadcast %353 : vector<2x1xf32> to vector<2x8xf32>
    %355 = arith.divf %351, %354 : vector<2x8xf32>
    %cst_126 = arith.constant dense<0.000000e+00> : vector<2x8xf32>
    %356 = tpu.matmul %355, %344, %cst_126 {dimension_numbers = #tpu.dot_dimension_numbers<[1], [0], [0], [1], [0, 0, 1, 1], [], []>} : vector<2x8xf32>, vector<8x8xf32>, vector<2x8xf32> -> vector<2x8xf32>
    %357 = tpu.concatenate %311, %326, %341, %356 in 1 : vector<2x8xf32>, vector<2x8xf32>, vector<2x8xf32>, vector<2x8xf32> -> vector<2x32xf32>
    %c344 = arith.constant 344 : index
    %c0_127 = arith.constant 0 : index
    %358 = vector.load %arg3[%c344, %c0_127] : memref<384x128xf32, #tpu.memory_space<vmem>>, vector<32x32xf32>
    %cst_128 = arith.constant dense<0.000000e+00> : vector<2x32xf32>
    %359 = tpu.matmul %357, %358, %cst_128 {dimension_numbers = #tpu.dot_dimension_numbers<[1], [0], [0], [1], [0, 0, 1, 1], [], []>} : vector<2x32xf32>, vector<32x32xf32>, vector<2x32xf32> -> vector<2x32xf32>
    %c376 = arith.constant 376 : index
    %c0_129 = arith.constant 0 : index
    %360 = vector.load %arg3[%c376, %c0_129] : memref<384x128xf32, #tpu.memory_space<vmem>>, vector<1x32xf32>
    %361 = vector.broadcast %360 : vector<1x32xf32> to vector<2x32xf32>
    %362 = arith.addf %359, %361 : vector<2x32xf32>
    %cst_130 = arith.constant 0.000000e+00 : f32
    %363 = vector.broadcast %cst_130 : f32 to vector<2x6x128xf32>
    %c0_131 = arith.constant 0 : index
    %c0_132 = arith.constant 0 : index
    %c0_133 = arith.constant 0 : index
    %364 = vector.load %arg4[%c0_131, %c0_132, %c0_133] : memref<2x6x128xf32, #tpu.memory_space<vmem>>, vector<2x6x128xf32>
    tpu.vector_store %arg4[%c0_131, %c0_132, %c0_133], %363 {strides = array<i32>} : memref<2x6x128xf32, #tpu.memory_space<vmem>>, vector<2x6x128xf32>,
    %365 = vector.extract_strided_slice %95 {offsets = [0, 0], sizes = [6, 32], strides = [1, 1]} : vector<12x32xf32> to vector<6x32xf32>
    %c0_134 = arith.constant 0 : index
    %c0_135 = arith.constant 0 : index
    %c0_136 = arith.constant 0 : index
    %366 = vector.load %arg4[%c0_134, %c0_135, %c0_136] : memref<2x6x128xf32, #tpu.memory_space<vmem>>, vector<1x6x32xf32>
    %367 = vector.shape_cast %366 : vector<1x6x32xf32> to vector<6x32xf32>
    %368 = vector.shape_cast %365 : vector<6x32xf32> to vector<1x6x32xf32>
    tpu.vector_store %arg4[%c0_134, %c0_135, %c0_136], %368 {strides = array<i32>} : memref<2x6x128xf32, #tpu.memory_space<vmem>>, vector<1x6x32xf32>,
    %369 = vector.extract_strided_slice %176 {offsets = [0, 0], sizes = [4, 32], strides = [1, 1]} : vector<8x32xf32> to vector<4x32xf32>
    %c0_137 = arith.constant 0 : index
    %c0_138 = arith.constant 0 : index
    %c32 = arith.constant 32 : index
    %370 = vector.load %arg4[%c0_137, %c0_138, %c32] : memref<2x6x128xf32, #tpu.memory_space<vmem>>, vector<1x4x32xf32>
    %371 = vector.shape_cast %370 : vector<1x4x32xf32> to vector<4x32xf32>
    %372 = vector.shape_cast %369 : vector<4x32xf32> to vector<1x4x32xf32>
    tpu.vector_store %arg4[%c0_137, %c0_138, %c32], %372 {strides = array<i32>} : memref<2x6x128xf32, #tpu.memory_space<vmem>>, vector<1x4x32xf32>,
    %373 = vector.extract_strided_slice %276 {offsets = [0, 0], sizes = [1, 32], strides = [1, 1]} : vector<2x32xf32> to vector<1x32xf32>
    %c0_139 = arith.constant 0 : index
    %c0_140 = arith.constant 0 : index
    %c64_141 = arith.constant 64 : index
    %374 = vector.load %arg4[%c0_139, %c0_140, %c64_141] : memref<2x6x128xf32, #tpu.memory_space<vmem>>, vector<1x1x32xf32>
    %375 = vector.shape_cast %374 : vector<1x1x32xf32> to vector<1x32xf32>
    %376 = vector.shape_cast %373 : vector<1x32xf32> to vector<1x1x32xf32>
    tpu.vector_store %arg4[%c0_139, %c0_140, %c64_141], %376 {strides = array<i32>} : memref<2x6x128xf32, #tpu.memory_space<vmem>>, vector<1x1x32xf32>,
    %377 = vector.extract_strided_slice %362 {offsets = [0, 0], sizes = [1, 32], strides = [1, 1]} : vector<2x32xf32> to vector<1x32xf32>
    %c0_142 = arith.constant 0 : index
    %c0_143 = arith.constant 0 : index
    %c96 = arith.constant 96 : index
    %378 = vector.load %arg4[%c0_142, %c0_143, %c96] : memref<2x6x128xf32, #tpu.memory_space<vmem>>, vector<1x1x32xf32>
    %379 = vector.shape_cast %378 : vector<1x1x32xf32> to vector<1x32xf32>
    %380 = vector.shape_cast %377 : vector<1x32xf32> to vector<1x1x32xf32>
    tpu.vector_store %arg4[%c0_142, %c0_143, %c96], %380 {strides = array<i32>} : memref<2x6x128xf32, #tpu.memory_space<vmem>>, vector<1x1x32xf32>,
    %381 = vector.extract_strided_slice %95 {offsets = [6, 0], sizes = [6, 32], strides = [1, 1]} : vector<12x32xf32> to vector<6x32xf32>
    %c1_144 = arith.constant 1 : index
    %c0_145 = arith.constant 0 : index
    %c0_146 = arith.constant 0 : index
    %382 = vector.load %arg4[%c1_144, %c0_145, %c0_146] : memref<2x6x128xf32, #tpu.memory_space<vmem>>, vector<1x6x32xf32>
    %383 = vector.shape_cast %382 : vector<1x6x32xf32> to vector<6x32xf32>
    %384 = vector.shape_cast %381 : vector<6x32xf32> to vector<1x6x32xf32>
    tpu.vector_store %arg4[%c1_144, %c0_145, %c0_146], %384 {strides = array<i32>} : memref<2x6x128xf32, #tpu.memory_space<vmem>>, vector<1x6x32xf32>,
    %385 = vector.extract_strided_slice %176 {offsets = [4, 0], sizes = [4, 32], strides = [1, 1]} : vector<8x32xf32> to vector<4x32xf32>
    %c1_147 = arith.constant 1 : index
    %c0_148 = arith.constant 0 : index
    %c32_149 = arith.constant 32 : index
    %386 = vector.load %arg4[%c1_147, %c0_148, %c32_149] : memref<2x6x128xf32, #tpu.memory_space<vmem>>, vector<1x4x32xf32>
    %387 = vector.shape_cast %386 : vector<1x4x32xf32> to vector<4x32xf32>
    %388 = vector.shape_cast %385 : vector<4x32xf32> to vector<1x4x32xf32>
    tpu.vector_store %arg4[%c1_147, %c0_148, %c32_149], %388 {strides = array<i32>} : memref<2x6x128xf32, #tpu.memory_space<vmem>>, vector<1x4x32xf32>,
    %389 = vector.extract_strided_slice %276 {offsets = [1, 0], sizes = [1, 32], strides = [1, 1]} : vector<2x32xf32> to vector<1x32xf32>
    %c1_150 = arith.constant 1 : index
    %c0_151 = arith.constant 0 : index
    %c64_152 = arith.constant 64 : index
    %390 = vector.load %arg4[%c1_150, %c0_151, %c64_152] : memref<2x6x128xf32, #tpu.memory_space<vmem>>, vector<1x1x32xf32>
    %391 = vector.shape_cast %390 : vector<1x1x32xf32> to vector<1x32xf32>
    %392 = vector.shape_cast %389 : vector<1x32xf32> to vector<1x1x32xf32>
    tpu.vector_store %arg4[%c1_150, %c0_151, %c64_152], %392 {strides = array<i32>} : memref<2x6x128xf32, #tpu.memory_space<vmem>>, vector<1x1x32xf32>,
    %393 = vector.extract_strided_slice %362 {offsets = [1, 0], sizes = [1, 32], strides = [1, 1]} : vector<2x32xf32> to vector<1x32xf32>
    %c1_153 = arith.constant 1 : index
    %c0_154 = arith.constant 0 : index
    %c96_155 = arith.constant 96 : index
    %394 = vector.load %arg4[%c1_153, %c0_154, %c96_155] : memref<2x6x128xf32, #tpu.memory_space<vmem>>, vector<1x1x32xf32>
    %395 = vector.shape_cast %394 : vector<1x1x32xf32> to vector<1x32xf32>
    %396 = vector.shape_cast %393 : vector<1x32xf32> to vector<1x1x32xf32>
    tpu.vector_store %arg4[%c1_153, %c0_154, %c96_155], %396 {strides = array<i32>} : memref<2x6x128xf32, #tpu.memory_space<vmem>>, vector<1x1x32xf32>,
    return
  }
}

</mosaic_0001>

<bundles_post_ra>
// kernel: cross_attention_forward.1
= control target key start
LH: loop header
LB: loop body
LE: loop exit
PB: predicated region body
PF: predicated region fallthrough
CT: control target
= control target key end

     0   :  { %9 = vsyncpa [#allocation3], 0  ;;  %s4771_s15 = smov [#allocation2]   ;;  %s5408_s0 = inlined_call_operand.vmem [shape: f32[2,6,8], index: 0, kind: input, shape index: {}]   ;;  %s5409_s1 = inlined_call_operand.vmem [shape: f32[2,4,8], index: 1, kind: input, shape index: {}]   ;;  %s5410_s2 = inlined_call_operand.vmem [shape: f32[2,1,16], index: 2, kind: input, shape index: {}]   ;;  %s5411_s3 = inlined_call_operand.hbm [shape: f32[384,128], index: 3, kind: input, shape index: {}]   ;;  %s5412_s4 = inlined_call_operand.vmem [shape: f32[2,6,128], index: 4, kind: output, shape index: {}]  }
   0x1   :  { %s21_s16 = sshll.u32 %s4771_s15, 4  ;;  %s4747_s19 = scalar_lea.hbm %s5411_s3, 6144  ;;  %s22_s16 = int_to_ptr.vmem [resolvable:$true] %s21_s16 }
   0x2   :  { %p4748_p0 = scmp.ne.s32.totalorder %s5411_s3, %s4747_s19  ;;  %p4751_p1 = scmp.lt.u32.totalorder %s4747_s19, %s5411_s3 }
   0x4   :  { %p4753_p2 = pnand %p4751_p1, %p4748_p0 }
   0x6   :  { %4756 = shalt.err (!%p4753_p2)
}
   0x7   :  { %s4757_s24 = scalar_lea.vmem %s22_s16, 6144  ;;  %p4762_p4 = scmp.lt.s32.totalorder %s22_s16, %s22_s16 }
   0x8   :  { %p4758_p3 = scmp.ne.s32.totalorder %s22_s16, %s4757_s24  ;;  %p4763_p5 = scmp.lt.s32.totalorder %s4757_s24, %s4757_s24 }
   0xa   :  { %p4764_p6 = por %p4763_p5, %p4762_p4 }
   0xc   :  { %p4765_p7 = pnand %p4764_p6, %p4758_p3 }
   0xe   :  { %4768 = shalt.err (!%p4765_p7)
}
   0xf   :  { %s4772_s25 = smov 128   ;;  %s4773_s26 = smov 8  }
  0x10   :  { %27 = dma.hbm_to_vmem [thread:$0]  %s5411_s3, 6144, %s22_s16, [#allocation3], %s4772_s25, %s4772_s25, %s4773_s26  }
  0x11   :  { %4769 = dma.done.wait [#allocation3], 6144  }
  0x12   :  { %4770 = vsyncadd [#allocation3], 4294961152  ;;  %v58_v0 = vld [vmem:[#allocation2] sm:$0xff]  ;;  %v3891_v2 = vld [vmem:[%s5408_s0 + $0x8] sm:$0x3f]  ;;  %vm37_vm0 = vcmask 1045504  }
  0x13   :  { %v31_v1 = vld [vmem:[%s5408_s0] sm:$0x3f]  ;;  %4134 = vmatprep.subr.mxu1 %v58_v0  ;;  %v35_v3 = vrot.slane %v3891_v2, 2  ;;  %vm64_vm1 = vcmask 64512   ;;  %v3895_v5 = vld [vmem:[#allocation2 + $0x8] ss:$0 sm:$0xff] }
  0x14   :  { %4135 = vmatpush3.msra.mxu1 %v58_v0  ;;  %s4774_s0 = smov 96   ;;  %v4775_v11 = vmov 0.0   ;;  %vm4862_vm2 = vmpackc.low %vm64_vm1, %vm64_vm1  ;;  %vm145_vm3 = vcmask 48128   ;;  %v4776_v19 = vmov -1e+30   ;;  %vm245_vm4 = vcmask 93184  }
  0x15   :  { %v38_v4 = vsel %vm37_vm0, %v31_v1, %v35_v3  ;;  %3856 = vst [vmem:[%s5412_s4] sm:$0x3f] %v4775_v11  ;;  %3857 = vst [vmem:[%s5412_s4 + $0x8] sm:$0x3f] %v4775_v11  ;;  %v4873_v17 = vsel %vm145_vm3, -1e+30, %v4775_v11  ;;  %v4879_v20 = vsel %vm145_vm3, 0.0, %v4776_v19 }
  0x16   :  { %4136 = vmatprep.mubr.msk.f32.mxu1 %vm64_vm1, %v38_v4  ;;  %v4876_v18 = vrot.slane %v4873_v17, 2  ;;  %vm241_vm5 = vcmask 97280   ;;  %s4777_s10 = smov 64   ;;  %s4778_s11 = smov 88   ;;  %vm45_vm6 = vcmask 1043456   ;;  %vm4780_vm7 = vmmov 1  }
  0x17   :  { %4137 = vmatmul.mubr.msk.f32.vlgmr.msra.gmra.mrb[0].mxu1 %vm64_vm1, %v35_v3  ;;  %s4779_s12 = smov 120   ;;  %vm4897_vm8 = vmpackc.low %vm45_vm6, %vm4780_vm7  ;;  %s4781_s13 = smov 56   ;;  %vm4787_vm9 = vmmov 0   ;;  %vm1158_vm10 = vcmask 31744   ;;  %vm985_vm11 = vcmask 195584   ;;  %vm982_vm12 = vcmask 130048  }
  0x18   :  { %v4884_v21 = vsel %vm37_vm0, %v4879_v20, %v4876_v18  ;;  %s4782_s14 = smov 80   ;;  %s4783_s15 = smov 112   ;;  %vm997_vm13 = vcmask 261120   ;;  %vm1944_vm14 = vcmask 257024   ;;  %vm1921_vm15 = vcmask 259072   ;;  %v2849_v37 = vld [vmem:[#allocation2 + $0xd0] sm:$0xff] }
  0x19   :  { %s4784_s16 = smov 72   ;;  %s4785_s17 = smov 104   ;;  %vm3877_vm0 = vcmask 261126   ;;  %vm1931_vm3 = vcmask 1041408   ;;  %vm2223_vm7 = vcmask 91136  }
  0x1a   :  { %s4786_s18 = smov 48   ;;  %s4789_s23 = smov 16  }
  0x1b   :  { %s4790_s24 = smov 24   ;;  %s4792_s9 = smov 32  }
  0xea   :  { %v4138_v6 = vpop.f32.mrb[0].mxu1 }
  0xeb   :  { %v4840_v7 = vadd.f32 %v4138_v6, %v3895_v5  ;;  %v136_v8 = vpop.f32.mrb[1].mxu1 }
  0xec   :  { %v4842_v9 = vadd.f32 %v3895_v5, %v136_v8 }
  0xee   :  { %4143 = vmatprep.mubr.msk.f32.mxu1 %vm64_vm1, %v4842_v9  ;;  %v4848_v10 = vpack.i.bf16 %v4840_v7, %v4842_v9 }
  0xf0   :  { %4593 = vrot.lane.b32.xlu0 %v4848_v10, %s4774_s0 }
 0x162   :  { %v4594_v12 = vpop.permute.xlu0 %4593 }
 0x163   :  { %v4596_v13 = vunpack.i.h.bf16 %v4594_v12  ;;  %v4595_v14 = vunpack.i.l.bf16 %v4594_v12 }
 0x165   :  { %v4432_v16 = vpack.c.bf16 %v4596_v13, %v4595_v14 }
 0x167   :  { %4434 = vmatprep.subr.msk.bf16.mxu1 %vm4862_vm2, %v4432_v16 }
 0x168   :  { %4437 = vmatpush3.bf16.xpose.msk.msra.mxu1 %vm4862_vm2, %v4432_v16 }
 0x16f   :  { %4144 = vmatmul.mubr.msk.f32.vlgmr.msra.gmra.mrb[2].mxu1 %vm64_vm1, %v4840_v7 }
 0x242   :  { %v4145_v22 = vpop.f32.mrb[2].mxu1 }
 0x243   :  { %v238_v23 = vadd.f32 %v4145_v22, %v4876_v18  ;;  %v232_v24 = vpop.f32.mrb[3].mxu1 }
 0x244   :  { %v233_v25 = vadd.f32 %v232_v24, %v4884_v21 }
 0x245   :  { %v246_v26 = vsel %vm245_vm4, %v238_v23, -inf }
 0x246   :  { %247 = vmax.xlane.f32.xlu1 %v246_v26  ;;  %v242_v27 = vsel %vm241_vm5, %v233_v25, -inf }
 0x247   :  { %243 = vmax.xlane.f32.xlu0 %v242_v27 }
 0x257   :  { %4598 = vrot.lane.b32.xlu1 %v4848_v10, %s4777_s10 }
 0x25b   :  { %4603 = vrot.lane.b32.xlu1 %v4848_v10, %s4778_s11 }
 0x25d   :  { %355 = vrot.lane.b32.xlu0 %v4840_v7, %s4779_s12 }
 0x2d3   :  { %v248_v28 = vpop.xlane.xlu1 %247 }
 0x2d4   :  { %v250_v29 = vsub.f32 %v238_v23, %v248_v28  ;;  %v244_v30 = vpop.xlane.xlu0 %243 }
 0x2d5   :  { %v249_v31 = vsub.f32 %v233_v25, %v244_v30 }
 0x2d6   :  { %v253_v32 = vmul.f32 1.442695, %v250_v29 }
 0x2d7   :  { %v251_v33 = vmul.f32 1.442695, %v249_v31  ;;  %v4599_v34 = vpop.permute.xlu1 %4598 }
 0x2d8   :  { %4667 = vpow2.f32 %v253_v32  ;;  %v4601_v35 = vunpack.i.h.bf16 %v4599_v34  ;;  %v4600_v36 = vunpack.i.l.bf16 %v4599_v34  ;;  %v356_v54 = vpop.permute.xlu0 %355 }
 0x2d9   :  { %4669 = vpow2.f32 %v251_v33 }
 0x2da   :  { %v4438_v38 = vpack.c.bf16 %v4601_v35, %v4600_v36 }
 0x2db   :  { %v4604_v39 = vpop.permute.xlu1 %4603 }
 0x2dc   :  { %v4606_v40 = vunpack.i.h.bf16 %v4604_v39  ;;  %v4605_v41 = vunpack.i.l.bf16 %v4604_v39  ;;  %4440 = vmatprep.subr.msk.bf16.mxu0 %vm4897_vm8, %v4438_v38 }
 0x2dd   :  { %4443 = vmatpush3.bf16.msk.msra.mxu0 %vm4897_vm8, %v4438_v38 }
 0x2de   :  { %v4444_v42 = vpack.c.bf16 %v4606_v40, %v4605_v41 }
 0x2e0   :  { %4446 = vmatprep.subr.msk.bf16.mxu0 %vm4862_vm2, %v4444_v42 }
 0x2e2   :  { %v4668_v43 = vpop.eup %4667 }
 0x2e3   :  { %v258_v44 = vsel %vm245_vm4, %v4668_v43, 0.0  ;;  %v4670_v45 = vpop.eup %4669 }
 0x2e4   :  { %259 = vadd.xlane.f32.xlu1 %v258_v44  ;;  %v255_v46 = vsel %vm241_vm5, %v4670_v45, 0.0 }
 0x2e8   :  { %256 = vadd.xlane.f32.xlu1 %v255_v46 }
 0x2f9   :  { %353 = vrot.lane.b32.xlu1 %v4842_v9, %s4779_s12 }
 0x371   :  { %v260_v47 = vpop.xlane.xlu1 %259 }
 0x372   :  { %4671 = vrcp.f32 %v260_v47 }
 0x375   :  { %v257_v48 = vpop.xlane.xlu1 %256 }
 0x376   :  { %4673 = vrcp.f32 %v257_v48 }
 0x379   :  { %v354_v53 = vpop.permute.xlu1 %353 }
 0x37c   :  { %v4672_v49 = vpop.eup %4671 }
 0x37d   :  { %v264_v52 = vmul.f32 %v4672_v49, %v4668_v43 }
 0x380   :  { %v4674_v50 = vpop.eup %4673 }
 0x381   :  { %v262_v51 = vmul.f32 %v4674_v50, %v4670_v45 }
 0x383   :  { %4150 = vmatprep.mubr.msk.f32.mxu0 %vm241_vm5, %v262_v51 }
 0x384   :  { %4151 = vmatmul.mubr.msk.f32.vlgmr.msra.gmra.mrb[0].mxu0 %vm241_vm5, %v264_v52 }
 0x385   :  { %4449 = vmatpush3.bf16.xpose.msk.msra.mxu0 %vm4862_vm2, %v4444_v42  ;;  %4157 = vmatprep.mubr.msk.f32.mxu0 %vm64_vm1, %v354_v53 }
 0x38c   :  { %4158 = vmatmul.mubr.msk.f32.vlgmr.msra.gmra.mrb[2].mxu0 %vm64_vm1, %v356_v54 }
 0x457   :  { %v4917_v55 = vpop.f32.mrb[0].mxu0 }
 0x458   :  { %v4919_v56 = vpop.f32.mrb[1].mxu0 }
 0x45f   :  { %v4159_v57 = vpop.f32.mrb[2].mxu0 }
 0x460   :  { %v441_v58 = vadd.f32 %v4159_v57, %v4876_v18  ;;  %v435_v59 = vpop.f32.mrb[3].mxu0 }
 0x461   :  { %v436_v60 = vadd.f32 %v435_v59, %v4884_v21 }
 0x462   :  { %v447_v61 = vsel %vm245_vm4, %v441_v58, -inf }
 0x463   :  { %448 = vmax.xlane.f32.xlu0 %v447_v61  ;;  %v444_v62 = vsel %vm241_vm5, %v436_v60, -inf }
 0x464   :  { %445 = vmax.xlane.f32.xlu1 %v444_v62 }
 0x475   :  { %4608 = vrot.lane.b32.xlu1 %v4848_v10, %s4781_s13 }
 0x479   :  { %4613 = vrot.lane.b32.xlu0 %v4848_v10, %s4782_s14  ;;  %554 = vrot.lane.b32.xlu1 %v4842_v9, %s4783_s15 }
 0x4f0   :  { %v449_v63 = vpop.xlane.xlu0 %448 }
 0x4f1   :  { %v451_v0 = vsub.f32 %v441_v58, %v449_v63  ;;  %v446_v1 = vpop.xlane.xlu1 %445 }
 0x4f2   :  { %v450_v2 = vsub.f32 %v436_v60, %v446_v1 }
 0x4f3   :  { %v454_v3 = vmul.f32 1.442695, %v451_v0 }
 0x4f4   :  { %v452_v4 = vmul.f32 1.442695, %v450_v2  ;;  %v4614_v5 = vpop.permute.xlu0 %4613 }
 0x4f5   :  { %4675 = vpow2.f32 %v454_v3  ;;  %v4609_v6 = vpop.permute.xlu1 %4608  ;;  %v4616_v8 = vunpack.i.h.bf16 %v4614_v5  ;;  %v4615_v12 = vunpack.i.l.bf16 %v4614_v5  ;;  %v3892_v5 = vld [vmem:[%s5409_s1 + $0x4] sm:$0xf] }
 0x4f6   :  { %v4611_v13 = vunpack.i.h.bf16 %v4609_v6  ;;  %v4610_v14 = vunpack.i.l.bf16 %v4609_v6  ;;  %4677 = vpow2.f32 %v452_v4  ;;  %v43_v6 = vrot.slane %v3892_v5, 4 }
 0x4f7   :  { %v4456_v22 = vpack.c.bf16 %v4616_v8, %v4615_v12  ;;  %v1079_v8 = vld [vmem:[#allocation2 + $0x38] sm:$0xff]  ;;  %v39_v12 = vld [vmem:[%s5409_s1] sm:$0xf]  ;;  %s4788_s1 = smov 40  }
 0x4f8   :  { %v4450_v16 = vpack.c.bf16 %v4611_v13, %v4610_v14  ;;  %v46_v14 = vsel %vm45_vm6, %v39_v12, %v43_v6 }
 0x4f9   :  { %v555_v27 = vpop.permute.xlu1 %554 }
 0x4fa   :  { %4452 = vmatprep.subr.msk.bf16.mxu1 %vm4897_vm8, %v4450_v16 }
 0x4fb   :  { %4455 = vmatpush3.bf16.msk.msra.mxu1 %vm4897_vm8, %v4450_v16 }
 0x4fc   :  { %4458 = vmatprep.subr.msk.bf16.mxu1 %vm4862_vm2, %v4456_v22 }
 0x4ff   :  { %v4676_v23 = vpop.eup %4675 }
 0x500   :  { %v459_v24 = vsel %vm245_vm4, %v4676_v23, 0.0  ;;  %v4678_v25 = vpop.eup %4677 }
 0x501   :  { %460 = vadd.xlane.f32.xlu1 %v459_v24  ;;  %v456_v26 = vsel %vm241_vm5, %v4678_v25, 0.0 }
 0x505   :  { %457 = vadd.xlane.f32.xlu1 %v456_v26 }
 0x516   :  { %556 = vrot.lane.b32.xlu1 %v4840_v7, %s4783_s15 }
 0x58e   :  { %v461_v28 = vpop.xlane.xlu1 %460 }
 0x58f   :  { %4679 = vrcp.f32 %v461_v28 }
 0x592   :  { %v458_v29 = vpop.xlane.xlu1 %457 }
 0x593   :  { %4681 = vrcp.f32 %v458_v29 }
 0x596   :  { %v557_v34 = vpop.permute.xlu1 %556 }
 0x599   :  { %v4680_v30 = vpop.eup %4679 }
 0x59a   :  { %v465_v33 = vmul.f32 %v4680_v30, %v4676_v23 }
 0x59d   :  { %v4682_v31 = vpop.eup %4681 }
 0x59e   :  { %v463_v32 = vmul.f32 %v4682_v31, %v4678_v25  ;;  %v3929_v31 = vld [vmem:[#allocation2 + $0x40] ss:$0 sm:$0xff] }
 0x5a0   :  { %4164 = vmatprep.mubr.msk.f32.mxu1 %vm241_vm5, %v463_v32 }
 0x5a1   :  { %4165 = vmatmul.mubr.msk.f32.vlgmr.msra.gmra.mrb[4].mxu1 %vm241_vm5, %v465_v33 }
 0x5a2   :  { %4461 = vmatpush3.bf16.xpose.msk.msra.mxu1 %vm4862_vm2, %v4456_v22  ;;  %4171 = vmatprep.mubr.msk.f32.mxu1 %vm64_vm1, %v555_v27 }
 0x5a9   :  { %4172 = vmatmul.mubr.msk.f32.vlgmr.msra.gmra.mrb[6].mxu1 %vm64_vm1, %v557_v34 }
 0x674   :  { %v4947_v35 = vpop.f32.mrb[4].mxu1 }
 0x675   :  { %v4949_v36 = vpop.f32.mrb[5].mxu1 }
 0x67c   :  { %v4173_v38 = vpop.f32.mrb[6].mxu1 }
 0x67d   :  { %v642_v39 = vadd.f32 %v4173_v38, %v4876_v18  ;;  %v636_v40 = vpop.f32.mrb[7].mxu1 }
 0x67e   :  { %v637_v41 = vadd.f32 %v636_v40, %v4884_v21 }
 0x67f   :  { %v648_v42 = vsel %vm245_vm4, %v642_v39, -inf }
 0x680   :  { %649 = vmax.xlane.f32.xlu0 %v648_v42  ;;  %v645_v43 = vsel %vm241_vm5, %v637_v41, -inf }
 0x681   :  { %646 = vmax.xlane.f32.xlu1 %v645_v43 }
 0x70d   :  { %v650_v44 = vpop.xlane.xlu0 %649 }
 0x70e   :  { %v652_v45 = vsub.f32 %v642_v39, %v650_v44  ;;  %v647_v46 = vpop.xlane.xlu1 %646 }
 0x70f   :  { %v651_v47 = vsub.f32 %v637_v41, %v647_v46 }
 0x710   :  { %v655_v48 = vmul.f32 1.442695, %v652_v45 }
 0x711   :  { %v653_v49 = vmul.f32 1.442695, %v651_v47 }
 0x712   :  { %4683 = vpow2.f32 %v655_v48 }
 0x713   :  { %4685 = vpow2.f32 %v653_v49 }
 0x71c   :  { %v4684_v50 = vpop.eup %4683 }
 0x71d   :  { %v4686_v51 = vpop.eup %4685  ;;  %v660_v52 = vsel %vm245_vm4, %v4684_v50, 0.0 }
 0x71e   :  { %661 = vadd.xlane.f32.xlu1 %v660_v52  ;;  %v657_v53 = vsel %vm241_vm5, %v4686_v51, 0.0 }
 0x71f   :  { %658 = vadd.xlane.f32.xlu0 %v657_v53 }
 0x72f   :  { %4623 = vrot.lane.b32.xlu1 %v4848_v10, %s4784_s16 }
 0x733   :  { %755 = vrot.lane.b32.xlu1 %v4842_v9, %s4785_s17 }
 0x735   :  { %4618 = vrot.lane.b32.xlu0 %v4848_v10, %s4786_s18 }
 0x739   :  { %757 = vrot.lane.b32.xlu0 %v4840_v7, %s4785_s17 }
 0x7ab   :  { %v662_v54 = vpop.xlane.xlu1 %661 }
 0x7ac   :  { %4687 = vrcp.f32 %v662_v54  ;;  %v659_v57 = vpop.xlane.xlu0 %658 }
 0x7ad   :  { %4689 = vrcp.f32 %v659_v57 }
 0x7af   :  { %v4624_v58 = vpop.permute.xlu1 %4623 }
 0x7b0   :  { %v4619_v59 = vpop.permute.xlu0 %4618  ;;  %v4626_v60 = vunpack.i.h.bf16 %v4624_v58  ;;  %v4625_v61 = vunpack.i.l.bf16 %v4624_v58 }
 0x7b1   :  { %v4621_v62 = vunpack.i.h.bf16 %v4619_v59  ;;  %v4620_v63 = vunpack.i.l.bf16 %v4619_v59 }
 0x7b2   :  { %v4468_v1 = vpack.c.bf16 %v4626_v60, %v4625_v61 }
 0x7b3   :  { %v4462_v0 = vpack.c.bf16 %v4621_v62, %v4620_v63  ;;  %v756_v4 = vpop.permute.xlu1 %755  ;;  %v5058_v63 = vsel %vm1158_vm10, 0.0, %v4776_v19 }
 0x7b4   :  { %v758_v13 = vpop.permute.xlu0 %757 }
 0x7b5   :  { %4464 = vmatprep.subr.msk.bf16.mxu0 %vm4897_vm8, %v4462_v0 }
 0x7b6   :  { %v4688_v9 = vpop.eup %4687  ;;  %4467 = vmatpush3.bf16.msk.msra.mxu0 %vm4897_vm8, %v4462_v0 }
 0x7b7   :  { %v4690_v7 = vpop.eup %4689  ;;  %4470 = vmatprep.subr.msk.bf16.mxu0 %vm4862_vm2, %v4468_v1  ;;  %v666_v3 = vmul.f32 %v4688_v9, %v4684_v50 }
 0x7b8   :  { %v664_v2 = vmul.f32 %v4690_v7, %v4686_v51 }
 0x7ba   :  { %4178 = vmatprep.mubr.msk.f32.mxu0 %vm241_vm5, %v664_v2 }
 0x7bb   :  { %4179 = vmatmul.mubr.msk.f32.vlgmr.msra.gmra.mrb[4].mxu0 %vm241_vm5, %v666_v3 }
 0x7bc   :  { %4185 = vmatprep.mubr.msk.f32.mxu0 %vm64_vm1, %v756_v4 }
 0x7bf   :  { %4473 = vmatpush3.bf16.xpose.msk.msra.mxu0 %vm4862_vm2, %v4468_v1 }
 0x7c0   :  { %4206 = vmatprep.subr.mxu0 %v4775_v11 }
 0x7c6   :  { %4186 = vmatmul.mubr.msk.f32.vlgmr.msra.gmra.mrb[6].mxu0 %vm64_vm1, %v758_v13 }
 0x7c7   :  { %4207 = vmatpush3.msra.mxu0 %v1079_v8  ;;  %4208 = vmatprep.mubr.msk.f32.mxu0 %vm4787_vm9, %v4775_v11 }
 0x7c8   :  { %4211 = vmatprep.subr.mxu0 %v4775_v11 }
 0x7ca   :  { %4209 = vmatmul.mubr.msk.f32.vlgmr.msra.gmra.mrb[8].mxu0 %vm64_vm1, %v46_v14 }
 0x7cb   :  { %4213 = vmatprep.mubr.msk.f32.mxu0 %vm4787_vm9, %v4775_v11 }
 0x88e   :  { %v4991_v16 = vpop.f32.mrb[4].mxu0 }
 0x88f   :  { %v4993_v22 = vpop.f32.mrb[5].mxu0 }
 0x899   :  { %v4187_v23 = vpop.f32.mrb[6].mxu0 }
 0x89a   :  { %v843_v24 = vadd.f32 %v4187_v23, %v4876_v18  ;;  %v837_v25 = vpop.f32.mrb[7].mxu0 }
 0x89b   :  { %v838_v26 = vadd.f32 %v837_v25, %v4884_v21 }
 0x89c   :  { %v849_v27 = vsel %vm245_vm4, %v843_v24, -inf }
 0x89d   :  { %850 = vmax.xlane.f32.xlu0 %v849_v27  ;;  %v846_v28 = vsel %vm241_vm5, %v838_v26, -inf  ;;  %v1154_v29 = vpop.f32.mrb[8].mxu0 }
 0x89e   :  { %847 = vmax.xlane.f32.xlu1 %v846_v28  ;;  %v4210_v30 = vpop.f32.mrb[9].mxu0  ;;  %v4999_v32 = vadd.f32 %v3929_v31, %v1154_v29 }
 0x8af   :  { %1331 = vrot.lane.b32.xlu1 %v4999_v32, %s4778_s11 }
 0x8b3   :  { %1166 = vrot.lane.b32.xlu0 %v4999_v32, %s4774_s0  ;;  %1329 = vrot.lane.b32.xlu1 %v4999_v32, %s4779_s12 }
 0x8b7   :  { %1496 = vrot.lane.b32.xlu0 %v4999_v32, %s4782_s14  ;;  %1494 = vrot.lane.b32.xlu1 %v4999_v32, %s4783_s15 }
 0x8bb   :  { %1661 = vrot.lane.b32.xlu0 %v4999_v32, %s4784_s16  ;;  %1659 = vrot.lane.b32.xlu1 %v4999_v32, %s4785_s17 }
 0x92a   :  { %v851_v18 = vpop.xlane.xlu0 %850 }
 0x92b   :  { %v853_v21 = vsub.f32 %v843_v24, %v851_v18  ;;  %v848_v33 = vpop.xlane.xlu1 %847 }
 0x92c   :  { %v852_v34 = vsub.f32 %v838_v26, %v848_v33 }
 0x92d   :  { %v856_v38 = vmul.f32 1.442695, %v853_v21 }
 0x92e   :  { %v854_v39 = vmul.f32 1.442695, %v852_v34  ;;  %v1167_v40 = vpop.permute.xlu0 %1166 }
 0x92f   :  { %4691 = vpow2.f32 %v856_v38  ;;  %4212 = vmatpush3.xpose.msk.msra.mxu0 %vm64_vm1, %v1167_v40  ;;  %v1332_v41 = vpop.permute.xlu1 %1331 }
 0x930   :  { %4693 = vpow2.f32 %v854_v39  ;;  %4221 = vmatprep.subr.mxu0 %v4775_v11 }
 0x932   :  { %4214 = vmatmul.mubr.msk.f32.vlgmr.msra.gmra.mrb[10].mxu0 %vm64_vm1, %v4999_v32  ;;  %v1497_v43 = vpop.permute.xlu0 %1496 }
 0x933   :  { %4222 = vmatpush3.xpose.msk.msra.mxu0 %vm64_vm1, %v1332_v41  ;;  %v1330_v42 = vpop.permute.xlu1 %1329  ;;  %4223 = vmatprep.mubr.msk.f32.mxu0 %vm4787_vm9, %v4775_v11 }
 0x934   :  { %4231 = vmatprep.subr.mxu0 %v4775_v11 }
 0x936   :  { %4224 = vmatmul.mubr.msk.f32.vlgmr.msra.gmra.mrb[12].mxu0 %vm64_vm1, %v1330_v42  ;;  %v1662_v47 = vpop.permute.xlu0 %1661 }
 0x937   :  { %4232 = vmatpush3.xpose.msk.msra.mxu0 %vm64_vm1, %v1497_v43  ;;  %v1495_v44 = vpop.permute.xlu1 %1494  ;;  %4233 = vmatprep.mubr.msk.f32.mxu0 %vm4787_vm9, %v4775_v11 }
 0x938   :  { %4241 = vmatprep.subr.mxu0 %v4775_v11 }
 0x939   :  { %v4692_v45 = vpop.eup %4691 }
 0x93a   :  { %v4694_v46 = vpop.eup %4693  ;;  %4234 = vmatmul.mubr.msk.f32.vlgmr.msra.gmra.mrb[14].mxu0 %vm64_vm1, %v1495_v44  ;;  %v861_v48 = vsel %vm245_vm4, %v4692_v45, 0.0  ;;  %vm56_vm4 = vcmask 1040384  }
 0x93b   :  { %862 = vadd.xlane.f32.xlu1 %v861_v48  ;;  %4242 = vmatpush3.xpose.msk.msra.mxu0 %vm64_vm1, %v1662_v47  ;;  %v858_v49 = vsel %vm241_vm5, %v4694_v46, 0.0  ;;  %v1660_v50 = vpop.permute.xlu1 %1659 }
 0x93c   :  { %859 = vadd.xlane.f32.xlu0 %v858_v49  ;;  %4243 = vmatprep.mubr.msk.f32.mxu0 %vm4787_vm9, %v4775_v11  ;;  %v988_v49 = vld [vmem:[#allocation2 + $0x10] sm:$0xff] }
 0x93e   :  { %4244 = vmatmul.mubr.msk.f32.vlgmr.msra.gmra.mrb[16].mxu0 %vm64_vm1, %v1660_v50  ;;  %v989_v50 = vld [vmem:[#allocation2 + $0x18] sm:$0xff] }
 0x93f   :  { %4259 = vmatprep.mubr.msk.f32.mxu0 %vm4787_vm9, %v4775_v11 }
 0x94c   :  { %958 = vrot.lane.b32.xlu1 %v4949_v36, %s4773_s26 }
 0x950   :  { %960 = vrot.lane.b32.xlu1 %v4947_v35, %s4773_s26 }
 0x952   :  { %4628 = vrot.lane.b32.xlu0 %v4848_v10, %s4788_s1 }
 0x9c8   :  { %v863_v51 = vpop.xlane.xlu1 %862 }
 0x9c9   :  { %4695 = vrcp.f32 %v863_v51  ;;  %v860_v52 = vpop.xlane.xlu0 %859  ;;  %v4480_v51 = vpack.c.bf16 %v989_v50, %v988_v49 }
 0x9ca   :  { %4697 = vrcp.f32 %v860_v52  ;;  %v990_v52 = vld [vmem:[#allocation2 + $0x20] sm:$0xff] }
 0x9cc   :  { %v959_v53 = vpop.permute.xlu1 %958 }
 0x9cd   :  { %v5045_v54 = vsel %vm64_vm1, %v4919_v56, %v959_v53  ;;  %v4629_v57 = vpop.permute.xlu0 %4628  ;;  %v5054_v56 = vsel %vm1158_vm10, -1e+30, %v4775_v11  ;;  %v991_v53 = vld [vmem:[#allocation2 + $0x28] sm:$0xff]  ;;  %vm3882_vm10 = vcmask 779777  }
 0x9ce   :  { %v4631_v58 = vunpack.i.h.bf16 %v4629_v57  ;;  %v4630_v59 = vunpack.i.l.bf16 %v4629_v57  ;;  %v1162_v62 = vrot.slane %v5054_v56, 4  ;;  %v4484_v57 = vpack.c.bf16 %v991_v53, %v990_v52 }
 0x9d0   :  { %v4474_v36 = vpack.c.bf16 %v4631_v58, %v4630_v59  ;;  %v1164_v0 = vsel %vm45_vm6, %v5058_v63, %v1162_v62  ;;  %v5066_v26 = vpop.permute.xlu1 %960  ;;  %vm2067_vm6 = vcmask 392192  }
 0x9d2   :  { %4476 = vmatprep.subr.msk.bf16.mxu1 %vm4897_vm8, %v4474_v36 }
 0x9d3   :  { %v4696_v35 = vpop.eup %4695  ;;  %4479 = vmatpush3.bf16.msk.msra.mxu1 %vm4897_vm8, %v4474_v36 }
 0x9d4   :  { %v4698_v10 = vpop.eup %4697  ;;  %v867_v61 = vmul.f32 %v4696_v35, %v4692_v45  ;;  %4481 = vmatprep.subr.bf16.mxu1 %v4480_v51 }
 0x9d5   :  { %v865_v60 = vmul.f32 %v4698_v10, %v4694_v46 }
 0x9d7   :  { %4192 = vmatprep.mubr.msk.f32.mxu1 %vm241_vm5, %v865_v60 }
 0x9d8   :  { %4193 = vmatmul.mubr.msk.f32.vlgmr.msra.gmra.mrb[8].mxu1 %vm241_vm5, %v867_v61 }
 0x9d9   :  { %4483 = vmatpush3.bf16.msra.mxu1 %v4480_v51 }
 0x9da   :  { %4485 = vmatprep.subr.bf16.mxu1 %v4484_v57 }
 0x9dd   :  { %4487 = vmatpush3.bf16.msra.mxu1 %v4484_v57 }
 0x9de   :  { %4216 = vmatprep.subr.mxu1 %v4775_v11 }
 0xa05   :  { %v1238_v1 = vpop.f32.mrb[10].mxu0 }
 0xa06   :  { %v1239_v9 = vadd.f32 %v1238_v1, %v1164_v0  ;;  %v4215_v7 = vpop.f32.mrb[11].mxu0 }
 0xa08   :  { %v1242_v2 = vsel %vm64_vm1, %v1239_v9, -inf }
 0xa09   :  { %1243 = vmax.xlane.f32.xlu1 %v1242_v2  ;;  %v1403_v3 = vpop.f32.mrb[12].mxu0 }
 0xa0a   :  { %v1404_v4 = vadd.f32 %v1403_v3, %v1164_v0  ;;  %v4225_v5 = vpop.f32.mrb[13].mxu0 }
 0xa0c   :  { %v1407_v6 = vsel %vm64_vm1, %v1404_v4, -inf }
 0xa0d   :  { %1408 = vmax.xlane.f32.xlu1 %v1407_v6  ;;  %v1568_v8 = vpop.f32.mrb[14].mxu0 }
 0xa0e   :  { %v1569_v12 = vadd.f32 %v1568_v8, %v1164_v0  ;;  %v4235_v13 = vpop.f32.mrb[15].mxu0  ;;  %v1968_v8 = vld [vmem:[#allocation2 + $0x70] sm:$0xff] }
 0xa10   :  { %v1572_v19 = vsel %vm64_vm1, %v1569_v12, -inf }
 0xa11   :  { %1573 = vmax.xlane.f32.xlu1 %v1572_v19  ;;  %v1733_v14 = vpop.f32.mrb[16].mxu0 }
 0xa12   :  { %v1734_v23 = vadd.f32 %v1733_v14, %v1164_v0  ;;  %v4245_v24 = vpop.f32.mrb[17].mxu0 }
 0xa14   :  { %v1737_v25 = vsel %vm64_vm1, %v1734_v23, -inf }
 0xa15   :  { %1738 = vmax.xlane.f32.xlu1 %v1737_v25 }
 0xa96   :  { %v1244_v27 = vpop.xlane.xlu1 %1243 }
 0xa97   :  { %v1245_v28 = vsub.f32 %v1239_v9, %v1244_v27  ;;  %v1971_v27 = vld [vmem:[#allocation2 + $0x88] sm:$0xff] }
 0xa99   :  { %v1246_v29 = vmul.f32 1.442695, %v1245_v28 }
 0xa9a   :  { %v1409_v30 = vpop.xlane.xlu1 %1408 }
 0xa9b   :  { %4699 = vpow2.f32 %v1246_v29  ;;  %v1410_v31 = vsub.f32 %v1404_v4, %v1409_v30  ;;  %v1839_v29 = vld [vmem:[#allocation2 + $0x48] sm:$0xff]  ;;  %v1840_v30 = vld [vmem:[#allocation2 + $0x50] sm:$0xff] }
 0xa9d   :  { %v1411_v18 = vmul.f32 1.442695, %v1410_v31  ;;  %v4489_v31 = vpack.c.bf16 %v1840_v30, %v1839_v29  ;;  %v2058_v29 = vld [vmem:[#allocation2 + $0xa8] sm:$0xff]  ;;  %v2059_v30 = vld [vmem:[#allocation2 + $0xb0] sm:$0xff] }
 0xa9e   :  { %v1574_v41 = vpop.xlane.xlu1 %1573 }
 0xa9f   :  { %4701 = vpow2.f32 %v1411_v18  ;;  %v1575_v42 = vsub.f32 %v1569_v12, %v1574_v41  ;;  %v1969_v12 = vld [vmem:[#allocation2 + $0x78] sm:$0xff]  ;;  %v4791_v18 = vmov 0.0|0.0  }
 0xaa0   :  { %v4494_v14 = vpack.c.bf16 %v1969_v12, %v1968_v8  ;;  %4488 = vmatprep.subr.bf16.mxu0 %v4791_v18  ;;  %v3945_v12 = vld [vmem:[#allocation2 + $0x90] ss:$0 sm:$0xff] }
 0xaa1   :  { %v1576_v44 = vmul.f32 1.442695, %v1575_v42  ;;  %4490 = vmatpush3.bf16.msra.mxu0 %v4489_v31  ;;  %v4506_v31 = vpack.c.bf16 %v2059_v30, %v2058_v29 }
 0xaa2   :  { %v1739_v43 = vpop.xlane.xlu1 %1738  ;;  %4491 = vmatprep.subr.bf16.mxu0 %v4791_v18 }
 0xaa3   :  { %v1740_v45 = vsub.f32 %v1734_v23, %v1739_v43  ;;  %4703 = vpow2.f32 %v1576_v44 }
 0xaa5   :  { %v5068_v21 = vpop.eup %4699  ;;  %v1741_v46 = vmul.f32 1.442695, %v1740_v45 }
 0xaa6   :  { %v1248_v33 = vsel %vm64_vm1, %v5068_v21, 0.0 }
 0xaa7   :  { %1249 = vadd.xlane.f32.xlu1 %v1248_v33  ;;  %4705 = vpow2.f32 %v1741_v46  ;;  %v1841_v33 = vld [vmem:[#allocation2 + $0x58] sm:$0xff] }
 0xaa9   :  { %v5072_v34 = vpop.eup %4701 }
 0xaaa   :  { %v1413_v38 = vsel %vm64_vm1, %v5072_v34, 0.0 }
 0xaab   :  { %v4194_v39 = vpop.f32.mrb[8].mxu1  ;;  %1414 = vadd.xlane.f32.xlu0 %v1413_v38 }
 0xaac   :  { %v947_v40 = vpop.f32.mrb[9].mxu1 }
 0xaad   :  { %v5082_v47 = vpop.eup %4703 }
 0xaae   :  { %v1578_v48 = vsel %vm64_vm1, %v5082_v47, 0.0 }
 0xab8   :  { %968 = vrot.lane.b32.xlu1 %v4991_v16, %s4789_s23  ;;  %v5086_v16 = vpop.eup %4705 }
 0xac1   :  { %966 = vrot.lane.b32.xlu0 %v4993_v22, %s4789_s23  ;;  %v1743_v22 = vsel %vm64_vm1, %v5086_v16, 0.0 }
 0xac5   :  { %1748 = vrot.lane.b32.xlu0 %v4999_v32, %s4788_s1 }
 0xadc   :  { %1579 = vadd.xlane.f32.xlu1 %v1578_v48 }
 0xae0   :  { %1744 = vadd.xlane.f32.xlu1 %v1743_v22 }
 0xaf1   :  { %974 = vrot.lane.b32.xlu1 %v947_v40, %s4790_s24 }
 0xaf5   :  { %976 = vrot.lane.b32.xlu1 %v4194_v39, %s4790_s24 }
 0xaf9   :  { %1253 = vrot.lane.b32.xlu1 %v4999_v32, %s4777_s10 }
 0xafd   :  { %1418 = vrot.lane.b32.xlu1 %v4999_v32, %s4781_s13 }
 0xb01   :  { %1583 = vrot.lane.b32.xlu1 %v4999_v32, %s4786_s18  ;;  %v981_v32 = vsel %vm64_vm1, %v4917_v55, %v5066_v26  ;;  %v1970_v26 = vld [vmem:[#allocation2 + $0x80] sm:$0xff] }
 0xb02   :  { %v4498_v28 = vpack.c.bf16 %v1971_v27, %v1970_v26 }
 0xb34   :  { %v1250_v58 = vpop.xlane.xlu1 %1249 }
 0xb35   :  { %4707 = vrcp.f32 %v1250_v58  ;;  %v47_v58 = vld [vmem:[%s5410_s2] sm:$0x1] }
 0xb38   :  { %v969_v59 = vpop.permute.xlu1 %968  ;;  %v1415_v36 = vpop.xlane.xlu0 %1414 }
 0xb39   :  { %4709 = vrcp.f32 %v1415_v36  ;;  %v984_v1 = vsel %vm982_vm12, %v981_v32, %v969_v59  ;;  %v3894_v59 = vld [vmem:[%s5410_s2 + $0x1] ss:$0 sm:$0xff] }
 0xb3c   :  { %v967_v60 = vpop.permute.xlu0 %966 }
 0xb3d   :  { %v983_v61 = vsel %vm982_vm12, %v5045_v54, %v967_v60 }
 0xb3f   :  { %v4708_v7 = vpop.eup %4707 }
 0xb40   :  { %v1252_v54 = vmul.f32 %v4708_v7, %v5068_v21  ;;  %v1749_v24 = vpop.permute.xlu0 %1748  ;;  %v3926_v21 = vld [vmem:[#allocation2 + $0x30] ss:$0 sm:$0xff] }
 0xb43   :  { %v4710_v4 = vpop.eup %4709 }
 0xb44   :  { %v1417_v55 = vmul.f32 %v4710_v4, %v5072_v34  ;;  %v1842_v34 = vld [vmem:[#allocation2 + $0x60] sm:$0xff] }
 0xb45   :  { %v4492_v39 = vpack.c.bf16 %v1842_v34, %v1841_v33  ;;  %v2061_v33 = vld [vmem:[#allocation2 + $0xc0] sm:$0xff] }
 0xb47   :  { %4493 = vmatpush3.bf16.msra.mxu0 %v4492_v39 }
 0xb48   :  { %4502 = vmatprep.subr.bf16.mxu0 %v4791_v18 }
 0xb69   :  { %v1580_v35 = vpop.xlane.xlu1 %1579 }
 0xb6a   :  { %4711 = vrcp.f32 %v1580_v35 }
 0xb6d   :  { %v1745_v10 = vpop.xlane.xlu1 %1744 }
 0xb6e   :  { %4713 = vrcp.f32 %v1745_v10 }
 0xb71   :  { %v975_v62 = vpop.permute.xlu1 %974 }
 0xb72   :  { %v986_v0 = vsel %vm985_vm11, %v983_v61, %v975_v62  ;;  %v57_v61 = vsel %vm56_vm4, %v47_v58, %v3894_v59 }
 0xb73   :  { %4203 = vmatprep.mubr.msk.f32.mxu1 %vm997_vm13, %v986_v0 }
 0xb74   :  { %v4712_v6 = vpop.eup %4711 }
 0xb75   :  { %v977_v9 = vpop.permute.xlu1 %976  ;;  %v1582_v13 = vmul.f32 %v4712_v6, %v5082_v47 }
 0xb76   :  { %v987_v2 = vsel %vm985_vm11, %v984_v1, %v977_v9 }
 0xb77   :  { %4204 = vmatmul.mubr.msk.f32.vlgmr.msra.gmra.mrb[10].mxu1 %vm997_vm13, %v987_v2 }
 0xb78   :  { %4218 = vmatprep.mubr.msk.f32.mxu1 %vm4787_vm9, %v4775_v11  ;;  %v4714_v23 = vpop.eup %4713 }
 0xb79   :  { %v1254_v3 = vpop.permute.xlu1 %1253  ;;  %v1747_v25 = vmul.f32 %v4714_v23, %v5086_v16 }
 0xb7a   :  { %4217 = vmatpush3.msra.mxu1 %v1254_v3 }
 0xb7b   :  { %4219 = vmatmul.mubr.msk.f32.vlgmr.msra.gmra.mrb[12].mxu1 %vm64_vm1, %v1252_v54  ;;  %4226 = vmatprep.subr.mxu1 %v4775_v11 }
 0xb7c   :  { %4228 = vmatprep.mubr.msk.f32.mxu1 %vm4787_vm9, %v4775_v11 }
 0xb7d   :  { %v1419_v5 = vpop.permute.xlu1 %1418 }
 0xb7e   :  { %4227 = vmatpush3.msra.mxu1 %v1419_v5 }
 0xb7f   :  { %4229 = vmatmul.mubr.msk.f32.vlgmr.msra.gmra.mrb[14].mxu1 %vm64_vm1, %v1417_v55  ;;  %4236 = vmatprep.subr.mxu1 %v4775_v11 }
 0xb80   :  { %4238 = vmatprep.mubr.msk.f32.mxu1 %vm4787_vm9, %v4775_v11 }
 0xb81   :  { %v1584_v19 = vpop.permute.xlu1 %1583 }
 0xb82   :  { %4237 = vmatpush3.msra.mxu1 %v1584_v19  ;;  %v2056_v19 = vld [vmem:[#allocation2 + $0x98] sm:$0xff] }
 0xb83   :  { %4239 = vmatmul.mubr.msk.f32.vlgmr.msra.gmra.mrb[16].mxu1 %vm64_vm1, %v1582_v13  ;;  %4246 = vmatprep.subr.mxu1 %v4775_v11 }
 0xb84   :  { %4247 = vmatpush3.msra.mxu1 %v1749_v24  ;;  %4248 = vmatprep.mubr.msk.f32.mxu1 %vm4787_vm9, %v4775_v11 }
 0xb85   :  { %4495 = vmatprep.subr.bf16.mxu1 %v4494_v14 }
 0xb87   :  { %4249 = vmatmul.mubr.msk.f32.vlgmr.msra.gmra.mrb[18].mxu1 %vm64_vm1, %v1747_v25 }
 0xb88   :  { %4497 = vmatpush3.bf16.msra.mxu1 %v4494_v14  ;;  %v2057_v14 = vld [vmem:[#allocation2 + $0xa0] sm:$0xff] }
 0xb89   :  { %4499 = vmatprep.subr.bf16.mxu1 %v4498_v28  ;;  %v4503_v25 = vpack.c.bf16 %v2057_v14, %v2056_v19 }
 0xb8c   :  { %4501 = vmatpush3.bf16.msra.mxu1 %v4498_v28 }
 0xb8d   :  { %4511 = vmatprep.subr.bf16.mxu1 %v4791_v18 }
 0xc4a   :  { %v4205_v38 = vpop.f32.mrb[10].mxu1 }
 0xc4b   :  { %v1076_v40 = vadd.f32 %v4205_v38, %v3926_v21  ;;  %v1070_v41 = vpop.f32.mrb[11].mxu1  ;;  %v3943_v38 = vld [vmem:[#allocation2 + $0x68] ss:$0 sm:$0xff] }
 0xc4c   :  { %v1071_v42 = vadd.f32 %v3926_v21, %v1070_v41  ;;  %v2060_v21 = vld [vmem:[#allocation2 + $0xb8] sm:$0xff] }
 0xc4d   :  { %v1933_v43 = vrot.slane %v1076_v40, 6  ;;  %3991 = vst.msk [vmem:[%s5412_s4 + $0xa] sm:$0xf] %vm1944_vm14, %v1076_v40  ;;  %v4509_v34 = vpack.c.bf16 %v2061_v33, %v2060_v21 }
 0xc4e   :  { %v1922_v44 = vsel %vm1921_vm15, %v1071_v42, 0.0  ;;  %v1932_v45 = vrot.slane %v1071_v42, 6  ;;  %3858 = vst.msk [vmem:[%s5412_s4] sm:$0x3f] %vm1921_vm15, %v1071_v42  ;;  %v1325_v46 = vpop.f32.mrb[12].mxu1  ;;  %4270 = vmatprep.mubr.msk.f32.mxu1 %vm997_vm13, %v1071_v42 }
 0xc4f   :  { %3990 = vst.msk [vmem:[%s5412_s4 + $0x2] sm:$0xc0] %vm3877_vm0, %v1071_v42  ;;  %v1923_v47 = vrot.slane %v1922_v44, 4  ;;  %v4220_v48 = vpop.f32.mrb[13].mxu1  ;;  %4271 = vmatmul.mubr.msk.f32.vlgmr.msra.gmra.mrb[20].mxu1 %vm997_vm13, %v1076_v40 }
 0xc50   :  { %v1934_v16 = vsel %vm1931_vm3, %v1932_v45, %v1933_v43  ;;  %4292 = vmatprep.mubr.msk.f32.mxu1 %vm4787_vm9, %v4775_v11 }
 0xc51   :  { %v1924_v22 = vadd.f32 %v1923_v47, %v1922_v44  ;;  %v1936_v49 = vsel %vm1921_vm15, %v1934_v16, 0.0 }
 0xc52   :  { %v1490_v50 = vpop.f32.mrb[14].mxu1  ;;  %v1937_v51 = vrot.slane %v1936_v49, 4 }
 0xc53   :  { %1825 = vrot.lane.b32.xlu1 %v1490_v50, %s4773_s26  ;;  %v4230_v52 = vpop.f32.mrb[15].mxu1  ;;  %v1925_v53 = vrot.slane %v1924_v22, 2 }
 0xc54   :  { %v1938_v57 = vadd.f32 %v1937_v51, %v1936_v49 }
 0xc55   :  { %v1926_v36 = vadd.f32 %v1925_v53, %v1924_v22 }
 0xc56   :  { %v1655_v35 = vpop.f32.mrb[16].mxu1  ;;  %v1939_v10 = vrot.slane %v1938_v57, 2 }
 0xc57   :  { %1829 = vrot.lane.b32.xlu0 %v1655_v35, %s4789_s23  ;;  %v4240_v60 = vpop.f32.mrb[17].mxu1  ;;  %v1927_v62 = vrot.slane %v1926_v36, 1 }
 0xc58   :  { %v1940_v0 = vadd.f32 %v1939_v10, %v1938_v57 }
 0xc59   :  { %v1928_v7 = vadd.f32 %v1927_v62, %v1926_v36  ;;  %v3948_v62 = vld [vmem:[#allocation2 + $0xc8] ss:$0 sm:$0xff] }
 0xc5a   :  { %v1820_v32 = vpop.f32.mrb[18].mxu1  ;;  %v1941_v1 = vrot.slane %v1940_v0, 1 }
 0xc5b   :  { %1964 = vrot.lane.b32.xlu0 %v57_v61, %s4792_s9  ;;  %1833 = vrot.lane.b32.xlu1 %v1820_v32, %s4790_s24  ;;  %v4250_v9 = vpop.f32.mrb[19].mxu1 }
 0xc5c   :  { %v1942_v2 = vadd.f32 %v1941_v1, %v1940_v0 }
 0xc5e   :  { %v5161_v54 = vsel %vm56_vm4, %v1928_v7, %v1942_v2  ;;  %v2141_v7 = vrot.slane %v4873_v17, 7 }
 0xc60   :  { %v5210_v2 = vsel %vm56_vm4, %v4879_v20, %v2141_v7 }
 0xcc5   :  { %v1826_v3 = vpop.permute.xlu1 %1825 }
 0xcc6   :  { %v1836_v55 = vsel %vm64_vm1, %v1325_v46, %v1826_v3 }
 0xcc9   :  { %v1830_v4 = vpop.permute.xlu0 %1829 }
 0xcca   :  { %v1837_v5 = vsel %vm982_vm12, %v1836_v55, %v1830_v4 }
 0xccd   :  { %v1834_v6 = vpop.permute.xlu1 %1833  ;;  %v5185_v35 = vpop.permute.xlu0 %1964 }
 0xcce   :  { %v1838_v8 = vsel %vm985_vm11, %v1837_v5, %v1834_v6 }
 0xccf   :  { %4260 = vmatmul.mubr.msk.f32.vlgmr.msra.gmra.mrb[18].mxu0 %vm997_vm13, %v1838_v8 }
 0xcd0   :  { %4285 = vmatprep.mubr.msk.f32.mxu0 %vm4787_vm9, %v4775_v11  ;;  %4504 = vmatpush3.bf16.msra.mxu0 %v4503_v25 }
 0xcd1   :  { %4505 = vmatprep.subr.bf16.mxu0 %v4791_v18 }
 0xcd4   :  { %4507 = vmatpush3.bf16.msra.mxu0 %v4506_v31 }
 0xcd5   :  { %4508 = vmatprep.subr.bf16.mxu0 %v4791_v18 }
 0xcd8   :  { %4510 = vmatpush3.bf16.msra.mxu0 %v4509_v34 }
 0xcd9   :  { %4519 = vmatprep.subr.bf16.mxu0 %v4791_v18 }
 0xd22   :  { %v4272_v13 = vpop.f32.mrb[20].mxu1 }
 0xd23   :  { %v2053_v23 = vadd.f32 %v4272_v13, %v3945_v12  ;;  %v2047_v24 = vpop.f32.mrb[21].mxu1 }
 0xd24   :  { %v2048_v26 = vadd.f32 %v3945_v12, %v2047_v24 }
 0xd26   :  { %v5169_v27 = vpack.i.bf16 %v2053_v23, %v2048_v26  ;;  %v4512_v28 = vpack.c.bf16 %v2053_v23, %v2048_v26 }
 0xd28   :  { %4633 = vrot.lane.b32.xlu1 %v5169_v27, %s4779_s12  ;;  %4514 = vmatpush3.bf16.xpose.msk.msra.mxu1 %vm4862_vm2, %v4512_v28 }
 0xd29   :  { %4515 = vmatprep.subr.bf16.mxu1 %v4791_v18 }
 0xd9a   :  { %v4634_v50 = vpop.permute.xlu1 %4633 }
 0xd9b   :  { %v4636_v57 = vunpack.i.h.bf16 %v4634_v50  ;;  %v4635_v58 = vunpack.i.l.bf16 %v4634_v50 }
 0xd9d   :  { %v4520_v60 = vpack.c.bf16 %v4636_v57, %v4635_v58 }
 0xda2   :  { %v1917_v39 = vpop.f32.mrb[18].mxu0 }
 0xda3   :  { %v5179_v40 = vadd.f32 %v3943_v38, %v1917_v39  ;;  %v4261_v41 = vpop.f32.mrb[19].mxu0 }
 0xda5   :  { %v1945_v42 = vsel %vm1944_vm14, %v5179_v40, 0.0  ;;  %v1953_v43 = vrot.slane %v5179_v40, 4 }
 0xda6   :  { %v1946_v44 = vrot.slane %v1945_v42, 4 }
 0xda7   :  { %v1955_v45 = vsel %vm1944_vm14, %v1953_v43, 0.0 }
 0xda8   :  { %v1947_v46 = vadd.f32 %v1946_v44, %v1945_v42  ;;  %v1956_v47 = vrot.slane %v1955_v45, 4 }
 0xdaa   :  { %v1948_v48 = vrot.slane %v1947_v46, 2  ;;  %v1957_v16 = vadd.f32 %v1956_v47, %v1955_v45 }
 0xdac   :  { %v1949_v22 = vadd.f32 %v1948_v48, %v1947_v46  ;;  %v1958_v49 = vrot.slane %v1957_v16, 2 }
 0xdae   :  { %v1950_v51 = vrot.slane %v1949_v22, 1  ;;  %v1959_v52 = vadd.f32 %v1958_v49, %v1957_v16 }
 0xdb0   :  { %v1960_v53 = vrot.slane %v1959_v52, 1  ;;  %v1951_v59 = vadd.f32 %v1950_v51, %v1949_v22 }
 0xdb2   :  { %v1961_v36 = vadd.f32 %v1960_v53, %v1959_v52 }
 0xdb4   :  { %v1962_v10 = vsel %vm56_vm4, %v1951_v59, %v1961_v36 }
 0xdb5   :  { %v1967_v61 = vsel %vm997_vm13, %v1962_v10, %v5185_v35 }
 0xdb6   :  { %4286 = vmatmul.mubr.msk.f32.vlgmr.msra.gmra.mrb[20].mxu0 %vm2067_vm6, %v1967_v61 }
 0xdb7   :  { %4522 = vmatpush3.bf16.xpose.msk.msra.mxu0 %vm4862_vm2, %v4520_v60  ;;  %4306 = vmatprep.mubr.msk.f32.mxu0 %vm4787_vm9, %v4775_v11 }
 0xdb8   :  { %4531 = vmatprep.subr.bf16.mxu0 %v4791_v18 }
 0xe89   :  { %v2137_v0 = vpop.f32.mrb[20].mxu0 }
 0xe8a   :  { %v5196_v32 = vadd.f32 %v3948_v62, %v2137_v0  ;;  %v4287_v1 = vpop.f32.mrb[21].mxu0 }
 0xe8c   :  { %2315 = vrot.lane.b32.xlu0 %v5196_v32, %s4779_s12  ;;  %4293 = vmatmul.mubr.msk.f32.vlgmr.msra.gmra.mrb[22].mxu1 %vm64_vm1, %v5196_v32 }
 0xe8d   :  { %4299 = vmatprep.mubr.msk.f32.mxu1 %vm4787_vm9, %v4775_v11 }
 0xefe   :  { %v2316_v9 = vpop.permute.xlu0 %2315 }
 0xeff   :  { %4307 = vmatmul.mubr.msk.f32.vlgmr.msra.gmra.mrb[22].mxu0 %vm64_vm1, %v2316_v9 }
 0xf00   :  { %4327 = vmatprep.mubr.msk.f32.mxu0 %vm4787_vm9, %v4775_v11 }
 0xf5f   :  { %v2219_v3 = vpop.f32.mrb[22].mxu1 }
 0xf60   :  { %v2220_v4 = vadd.f32 %v2219_v3, %v5210_v2  ;;  %v4294_v55 = vpop.f32.mrb[23].mxu1 }
 0xf62   :  { %v2224_v5 = vsel %vm2223_vm7, %v2220_v4, -inf }
 0xf63   :  { %2225 = vmax.xlane.f32.xlu1 %v2224_v5 }
 0xf74   :  { %4638 = vrot.lane.b32.xlu1 %v5169_v27, %s4774_s0 }
 0xf78   :  { %4648 = vrot.lane.b32.xlu1 %v5169_v27, %s4783_s15 }
 0xf7c   :  { %2488 = vrot.lane.b32.xlu1 %v5196_v32, %s4783_s15 }
 0xfd2   :  { %v2393_v17 = vpop.f32.mrb[22].mxu0 }
 0xfd3   :  { %v2394_v20 = vadd.f32 %v2393_v17, %v5210_v2  ;;  %v4308_v6 = vpop.f32.mrb[23].mxu0 }
 0xfd5   :  { %v2397_v8 = vsel %vm2223_vm7, %v2394_v20, -inf }
 0xfd6   :  { %2398 = vmax.xlane.f32.xlu0 %v2397_v8 }
 0xff0   :  { %v2226_v12 = vpop.xlane.xlu1 %2225 }
 0xff1   :  { %v2227_v13 = vsub.f32 %v2220_v4, %v2226_v12  ;;  %v2932_v12 = vld [vmem:[#allocation2 + $0xf8] sm:$0xff] }
 0xff3   :  { %v2228_v19 = vmul.f32 1.442695, %v2227_v13  ;;  %v2933_v13 = vld [vmem:[#allocation2 + $0x100] sm:$0xff] }
 0xff4   :  { %v4639_v14 = vpop.permute.xlu1 %4638 }
 0xff5   :  { %4715 = vpow2.f32 %v2228_v19  ;;  %v4641_v23 = vunpack.i.h.bf16 %v4639_v14  ;;  %v4640_v24 = vunpack.i.l.bf16 %v4639_v14  ;;  %v4550_v19 = vpack.c.bf16 %v2933_v13, %v2932_v12  ;;  %v2934_v14 = vld [vmem:[#allocation2 + $0x108] sm:$0xff] }
 0xff7   :  { %v4516_v25 = vpack.c.bf16 %v4641_v23, %v4640_v24  ;;  %v2935_v23 = vld [vmem:[#allocation2 + $0x110] sm:$0xff] }
 0xff8   :  { %v4649_v46 = vpop.permute.xlu1 %4648 }
 0xff9   :  { %4518 = vmatpush3.bf16.msk.msra.mxu1 %vm4897_vm8, %v4516_v25  ;;  %v4651_v48 = vunpack.i.h.bf16 %v4649_v46  ;;  %v4650_v16 = vunpack.i.l.bf16 %v4649_v46  ;;  %v4553_v25 = vpack.c.bf16 %v2935_v23, %v2934_v14 }
 0xffa   :  { %4523 = vmatprep.subr.bf16.mxu1 %v4791_v18 }
 0xffb   :  { %v4528_v49 = vpack.c.bf16 %v4651_v48, %v4650_v16 }
 0xffc   :  { %v2489_v50 = vpop.permute.xlu1 %2488 }
 0xfff   :  { %v4716_v26 = vpop.eup %4715 }
0x1000   :  { %v2230_v28 = vsel %vm2223_vm7, %v4716_v26, 0.0 }
0x1001   :  { %2231 = vadd.xlane.f32.xlu0 %v2230_v28 }
0x1063   :  { %v2399_v29 = vpop.xlane.xlu0 %2398 }
0x1064   :  { %v2400_v30 = vsub.f32 %v2394_v20, %v2399_v29 }
0x1066   :  { %v2401_v31 = vmul.f32 1.442695, %v2400_v30 }
0x1068   :  { %4717 = vpow2.f32 %v2401_v31 }
0x1072   :  { %v4718_v21 = vpop.eup %4717 }
0x1073   :  { %v2403_v33 = vsel %vm2223_vm7, %v4718_v21, 0.0 }
0x1074   :  { %2404 = vadd.xlane.f32.xlu0 %v2403_v33 }
0x108a   :  { %4643 = vrot.lane.b32.xlu0 %v5169_v27, %s4778_s11 }
0x108e   :  { %v2232_v34 = vpop.xlane.xlu0 %2231 }
0x108f   :  { %4719 = vrcp.f32 %v2232_v34 }
0x1099   :  { %v4720_v38 = vpop.eup %4719 }
0x109a   :  { %v2234_v39 = vmul.f32 %v4720_v38, %v4716_v26 }
0x109c   :  { %4300 = vmatmul.mubr.msk.f32.vlgmr.msra.gmra.mrb[24].mxu1 %vm241_vm5, %v2234_v39 }
0x109d   :  { %4313 = vmatprep.mubr.msk.f32.mxu1 %vm4787_vm9, %v4775_v11 }
0x1101   :  { %v2405_v41 = vpop.xlane.xlu0 %2404 }
0x1102   :  { %4721 = vrcp.f32 %v2405_v41 }
0x1105   :  { %v4644_v42 = vpop.permute.xlu0 %4643 }
0x1106   :  { %v4646_v43 = vunpack.i.h.bf16 %v4644_v42  ;;  %v4645_v44 = vunpack.i.l.bf16 %v4644_v42 }
0x1108   :  { %v4524_v45 = vpack.c.bf16 %v4646_v43, %v4645_v44 }
0x110a   :  { %4526 = vmatpush3.bf16.msk.msra.mxu1 %vm4897_vm8, %v4524_v45 }
0x110b   :  { %4527 = vmatprep.subr.bf16.mxu1 %v4791_v18 }
0x110c   :  { %v4722_v47 = vpop.eup %4721 }
0x110d   :  { %v2407_v22 = vmul.f32 %v4722_v47, %v4718_v21  ;;  %v3972_v21 = vld [vmem:[#allocation2 + $0x118] ss:$0 sm:$0xff] }
0x110f   :  { %4314 = vmatmul.mubr.msk.f32.vlgmr.msra.gmra.mrb[26].mxu1 %vm241_vm5, %v2407_v22  ;;  %v2850_v22 = vld [vmem:[#allocation2 + $0xd8] sm:$0xff] }
0x1110   :  { %4320 = vmatprep.mubr.msk.f32.mxu1 %vm4787_vm9, %v4775_v11 }
0x1113   :  { %4530 = vmatpush3.bf16.xpose.msk.msra.mxu1 %vm4862_vm2, %v4528_v49  ;;  %v2851_v49 = vld [vmem:[#allocation2 + $0xe0] sm:$0xff] }
0x1114   :  { %4539 = vmatprep.subr.bf16.mxu1 %v4791_v18 }
0x111a   :  { %4321 = vmatmul.mubr.msk.f32.vlgmr.msra.gmra.mrb[28].mxu1 %vm64_vm1, %v2489_v50  ;;  %v4544_v50 = vpack.c.bf16 %v2850_v22, %v2849_v37 }
0x111b   :  { %4341 = vmatprep.mubr.msk.f32.mxu1 %vm4787_vm9, %v4775_v11 }
0x116f   :  { %v5244_v51 = vpop.f32.mrb[24].mxu1 }
0x1170   :  { %v4301_v52 = vpop.f32.mrb[25].mxu1 }
0x1171   :  { %v2852_v52 = vld [vmem:[#allocation2 + $0xe8] sm:$0xff] }
0x11e2   :  { %v5246_v53 = vpop.f32.mrb[26].mxu1 }
0x11e3   :  { %v4315_v57 = vpop.f32.mrb[27].mxu1 }
0x11e4   :  { %v4547_v57 = vpack.c.bf16 %v2852_v52, %v2851_v49 }
0x11ed   :  { %v2566_v58 = vpop.f32.mrb[28].mxu1 }
0x11ee   :  { %v2567_v59 = vadd.f32 %v2566_v58, %v5210_v2  ;;  %v4322_v36 = vpop.f32.mrb[29].mxu1 }
0x11ef   :  { %v3013_v36 = vld [vmem:[#allocation2 + $0x120] sm:$0xff] }
0x11f0   :  { %v2570_v10 = vsel %vm2223_vm7, %v2567_v59, -inf }
0x11f1   :  { %2571 = vmax.xlane.f32.xlu1 %v2570_v10  ;;  %v3014_v10 = vld [vmem:[#allocation2 + $0x128] sm:$0xff] }
0x1202   :  { %4658 = vrot.lane.b32.xlu1 %v5169_v27, %s4785_s17 }
0x1206   :  { %2661 = vrot.lane.b32.xlu1 %v5196_v32, %s4785_s17 }
0x127e   :  { %v2572_v60 = vpop.xlane.xlu1 %2571 }
0x127f   :  { %v2573_v61 = vsub.f32 %v2567_v59, %v2572_v60 }
0x1281   :  { %v2574_v62 = vmul.f32 1.442695, %v2573_v61 }
0x1282   :  { %v4659_v5 = vpop.permute.xlu1 %4658 }
0x1283   :  { %4723 = vpow2.f32 %v2574_v62  ;;  %v4661_v17 = vunpack.i.h.bf16 %v4659_v5  ;;  %v4660_v20 = vunpack.i.l.bf16 %v4659_v5  ;;  %v4556_v62 = vpack.c.bf16 %v3014_v10, %v3013_v36 }
0x1285   :  { %v4536_v8 = vpack.c.bf16 %v4661_v17, %v4660_v20 }
0x1286   :  { %v2662_v24 = vpop.permute.xlu1 %2661 }
0x128d   :  { %v4724_v0 = vpop.eup %4723 }
0x128e   :  { %v2576_v1 = vsel %vm2223_vm7, %v4724_v0, 0.0 }
0x128f   :  { %2577 = vadd.xlane.f32.xlu0 %v2576_v1 }
0x12a5   :  { %4653 = vrot.lane.b32.xlu0 %v5169_v27, %s4782_s14 }
0x131c   :  { %v2578_v9 = vpop.xlane.xlu0 %2577 }
0x131d   :  { %4725 = vrcp.f32 %v2578_v9  ;;  %v3015_v9 = vld [vmem:[#allocation2 + $0x130] sm:$0xff] }
0x1320   :  { %v4654_v7 = vpop.permute.xlu0 %4653 }
0x1321   :  { %v4656_v3 = vunpack.i.h.bf16 %v4654_v7  ;;  %v4655_v4 = vunpack.i.l.bf16 %v4654_v7  ;;  %v3016_v7 = vld [vmem:[#allocation2 + $0x138] sm:$0xff] }
0x1323   :  { %v4532_v55 = vpack.c.bf16 %v4656_v3, %v4655_v4  ;;  %v4559_v4 = vpack.c.bf16 %v3016_v7, %v3015_v9 }
0x1325   :  { %4534 = vmatpush3.bf16.msk.msra.mxu0 %vm4897_vm8, %v4532_v55  ;;  %v3017_v55 = vld [vmem:[#allocation2 + $0x140] sm:$0xff] }
0x1326   :  { %4535 = vmatprep.subr.bf16.mxu0 %v4791_v18 }
0x1327   :  { %v4726_v32 = vpop.eup %4725 }
0x1328   :  { %v2580_v6 = vmul.f32 %v4726_v32, %v4724_v0  ;;  %v2931_v32 = vsel %vm997_vm13, %v5161_v54, %v5185_v35 }
0x132a   :  { %4328 = vmatmul.mubr.msk.f32.vlgmr.msra.gmra.mrb[24].mxu0 %vm241_vm5, %v2580_v6  ;;  %v3974_v6 = vld [vmem:[#allocation2 + $0x150] ss:$0 sm:$0xff] }
0x132b   :  { %4334 = vmatprep.mubr.msk.f32.mxu0 %vm4787_vm9, %v4775_v11 }
0x132e   :  { %4538 = vmatpush3.bf16.xpose.msk.msra.mxu0 %vm4862_vm2, %v4536_v8  ;;  %vm3176_vm2 = vcmask 58368  }
0x132f   :  { %4549 = vmatprep.subr.bf16.mxu0 %v4791_v18 }
0x1335   :  { %4335 = vmatmul.mubr.msk.f32.vlgmr.msra.gmra.mrb[26].mxu0 %vm64_vm1, %v2662_v24 }
0x1336   :  { %4551 = vmatpush3.bf16.msra.mxu0 %v4550_v19  ;;  %4363 = vmatprep.mubr.msk.f32.mxu0 %vm4787_vm9, %v4775_v11  ;;  %v3097_v19 = vrot.slane %v5054_v56, 7 }
0x1337   :  { %4552 = vmatprep.subr.bf16.mxu0 %v4791_v18 }
0x1338   :  { %v3099_v54 = vsel %vm56_vm4, %v5058_v63, %v3097_v19 }
0x133a   :  { %4554 = vmatpush3.bf16.msra.mxu0 %v4553_v25 }
0x133b   :  { %4381 = vmatprep.subr.mxu0 %v4775_v11 }
0x133d   :  { %4364 = vmatmul.mubr.msk.f32.vlgmr.msra.gmra.mrb[28].mxu0 %vm997_vm13, %v5179_v40 }
0x133e   :  { %4383 = vmatprep.mubr.msk.f32.mxu0 %vm4787_vm9, %v4775_v11 }
0x13fd   :  { %v2657_v15 = vpop.f32.mrb[24].mxu0 }
0x13fe   :  { %v4329_v26 = vpop.f32.mrb[25].mxu0 }
0x1408   :  { %v2739_v28 = vpop.f32.mrb[26].mxu0 }
0x1409   :  { %v2740_v29 = vadd.f32 %v2739_v28, %v5210_v2  ;;  %v4336_v30 = vpop.f32.mrb[27].mxu0 }
0x140b   :  { %v2743_v31 = vsel %vm2223_vm7, %v2740_v29, -inf }
0x140c   :  { %2744 = vmax.xlane.f32.xlu0 %v2743_v31 }
0x1410   :  { %v3009_v33 = vpop.f32.mrb[28].mxu0 }
0x1411   :  { %v5277_v34 = vadd.f32 %v3972_v21, %v3009_v33  ;;  %v4365_v38 = vpop.f32.mrb[29].mxu0 }
0x1413   :  { %4382 = vmatpush3.xpose.msk.msra.mxu0 %vm64_vm1, %v5277_v34 }
0x1414   :  { %4386 = vmatprep.subr.mxu0 %v4775_v11 }
0x1422   :  { %4663 = vrot.lane.b32.xlu0 %v5169_v27, %s4784_s16 }
0x1426   :  { %2839 = vrot.lane.b32.xlu0 %v2657_v15, %s4789_s23 }
0x1499   :  { %v2745_v2 = vpop.xlane.xlu0 %2744 }
0x149a   :  { %v2746_v39 = vsub.f32 %v2740_v29, %v2745_v2 }
0x149c   :  { %v2747_v41 = vmul.f32 1.442695, %v2746_v39 }
0x149d   :  { %v4664_v42 = vpop.permute.xlu0 %4663 }
0x149e   :  { %4727 = vpow2.f32 %v2747_v41  ;;  %v4666_v43 = vunpack.i.h.bf16 %v4664_v42  ;;  %v4665_v44 = vunpack.i.l.bf16 %v4664_v42 }
0x14a0   :  { %v4540_v45 = vpack.c.bf16 %v4666_v43, %v4665_v44 }
0x14a1   :  { %v2840_v61 = vpop.permute.xlu0 %2839 }
0x14a2   :  { %4542 = vmatpush3.bf16.msk.msra.mxu1 %vm4897_vm8, %v4540_v45  ;;  %vm3880_vm8 = vcmask 523524  }
0x14a3   :  { %4543 = vmatprep.subr.bf16.mxu1 %v4791_v18 }
0x14a8   :  { %v4728_v46 = vpop.eup %4727 }
0x14a9   :  { %v2749_v47 = vsel %vm2223_vm7, %v4728_v46, 0.0 }
0x14aa   :  { %2750 = vadd.xlane.f32.xlu1 %v2749_v47 }
0x14bb   :  { %2835 = vrot.lane.b32.xlu1 %v5246_v53, %s4773_s26 }
0x1537   :  { %v2751_v27 = vpop.xlane.xlu1 %2750 }
0x1538   :  { %4729 = vrcp.f32 %v2751_v27 }
0x153b   :  { %v2836_v59 = vpop.permute.xlu1 %2835 }
0x153c   :  { %v2846_v60 = vsel %vm64_vm1, %v5244_v51, %v2836_v59  ;;  %v3018_v51 = vld [vmem:[#allocation2 + $0x148] sm:$0xff] }
0x153d   :  { %v2847_v0 = vsel %vm982_vm12, %v2846_v60, %v2840_v61  ;;  %v4562_v5 = vpack.c.bf16 %v3018_v51, %v3017_v55 }
0x1542   :  { %v4730_v48 = vpop.eup %4729 }
0x1543   :  { %v2753_v16 = vmul.f32 %v4730_v48, %v4728_v46 }
0x1545   :  { %4342 = vmatmul.mubr.msk.f32.vlgmr.msra.gmra.mrb[30].mxu1 %vm241_vm5, %v2753_v16  ;;  %vm3862_vm5 = vcmask 519424  }
0x1546   :  { %4352 = vmatprep.mubr.msk.f32.mxu1 %vm4787_vm9, %v4775_v11  ;;  %4545 = vmatpush3.bf16.msra.mxu1 %v4544_v50 }
0x1547   :  { %4546 = vmatprep.subr.bf16.mxu1 %v4791_v18 }
0x154a   :  { %4548 = vmatpush3.bf16.msra.mxu1 %v4547_v57 }
0x154b   :  { %4555 = vmatprep.subr.bf16.mxu1 %v4791_v18 }
0x1618   :  { %v2830_v53 = vpop.f32.mrb[30].mxu1 }
0x1619   :  { %2843 = vrot.lane.b32.xlu1 %v2830_v53, %s4790_s24  ;;  %v4343_v58 = vpop.f32.mrb[31].mxu1 }
0x161d   :  { %3266 = vrot.lane.b32.xlu1 %v5277_v34, %s4779_s12 }
0x1621   :  { %3431 = vrot.lane.b32.xlu1 %v5277_v34, %s4783_s15 }
0x168b   :  { %v2844_v1 = vpop.permute.xlu1 %2843 }
0x168c   :  { %v2848_v3 = vsel %vm985_vm11, %v2847_v0, %v2844_v1 }
0x168d   :  { %4353 = vmatmul.mubr.msk.f32.vlgmr.msra.gmra.mrb[32].mxu1 %vm997_vm13, %v2848_v3 }
0x168e   :  { %4557 = vmatpush3.bf16.msra.mxu1 %v4556_v62  ;;  %4378 = vmatprep.mubr.msk.f32.mxu1 %vm4787_vm9, %v4775_v11 }
0x168f   :  { %4558 = vmatprep.subr.bf16.mxu1 %v4791_v18  ;;  %v3267_v29 = vpop.permute.xlu1 %3266 }
0x1692   :  { %4560 = vmatpush3.bf16.msra.mxu1 %v4559_v4 }
0x1693   :  { %4561 = vmatprep.subr.bf16.mxu1 %v4791_v18  ;;  %v3432_v30 = vpop.permute.xlu1 %3431 }
0x1696   :  { %4563 = vmatpush3.bf16.msra.mxu1 %v4562_v5 }
0x1697   :  { %4396 = vmatprep.subr.mxu1 %v4775_v11 }
0x1699   :  { %4379 = vmatmul.mubr.msk.f32.vlgmr.msra.gmra.mrb[34].mxu1 %vm2067_vm6, %v2931_v32 }
0x169a   :  { %4398 = vmatprep.mubr.msk.f32.mxu1 %vm4787_vm9, %v4775_v11 }
0x1760   :  { %v5317_v17 = vpop.f32.mrb[32].mxu1 }
0x1761   :  { %v4354_v20 = vpop.f32.mrb[33].mxu1 }
0x176c   :  { %v3093_v8 = vpop.f32.mrb[34].mxu1 }
0x176d   :  { %v3094_v12 = vadd.f32 %v3974_v6, %v3093_v8  ;;  %v4380_v13 = vpop.f32.mrb[35].mxu1 }
0x176f   :  { %4384 = vmatmul.mubr.msk.f32.vlgmr.msra.gmra.mrb[30].mxu0 %vm64_vm1, %v3094_v12 }
0x1770   :  { %4388 = vmatprep.mubr.msk.f32.mxu0 %vm4787_vm9, %v4775_v11 }
0x1842   :  { %v3172_v35 = vpop.f32.mrb[30].mxu0 }
0x1843   :  { %v3173_v14 = vadd.f32 %v3172_v35, %v3099_v54  ;;  %v4385_v23 = vpop.f32.mrb[31].mxu0  ;;  %v3774_v35 = vld [vmem:[#allocation2 + $0x158] sm:$0xff] }
0x1845   :  { %v3177_v24 = vsel %vm3176_vm2, %v3173_v14, -inf }
0x1846   :  { %3178 = vmax.xlane.f32.xlu0 %v3177_v24  ;;  %v3776_v24 = vld [vmem:[#allocation2 + $0x168] sm:$0xff] }
0x185c   :  { %3188 = vrot.lane.b32.xlu0 %v5277_v34, %s4774_s0 }
0x1860   :  { %3264 = vrot.lane.b32.xlu0 %v3094_v12, %s4779_s12 }
0x1864   :  { %3429 = vrot.lane.b32.xlu0 %v3094_v12, %s4783_s15 }
0x1868   :  { %3594 = vrot.lane.b32.xlu0 %v3094_v12, %s4785_s17 }
0x18d3   :  { %v3179_v56 = vpop.xlane.xlu0 %3178 }
0x18d4   :  { %v3180_v25 = vsub.f32 %v3173_v14, %v3179_v56  ;;  %v3775_v14 = vld [vmem:[#allocation2 + $0x160] sm:$0xff]  ;;  %v3777_v56 = vld [vmem:[#allocation2 + $0x170] sm:$0xff] }
0x18d5   :  { %v4565_v23 = vpack.c.bf16 %v3775_v14, %v3774_v35 }
0x18d6   :  { %v3181_v15 = vmul.f32 1.442695, %v3180_v25  ;;  %v4568_v25 = vpack.c.bf16 %v3777_v56, %v3776_v24 }
0x18d7   :  { %v3189_v63 = vpop.permute.xlu0 %3188 }
0x18d8   :  { %4731 = vpow2.f32 %v3181_v15  ;;  %4387 = vmatpush3.msra.mxu0 %v3189_v63 }
0x18d9   :  { %4391 = vmatprep.subr.mxu0 %v4775_v11 }
0x18db   :  { %v3265_v38 = vpop.permute.xlu0 %3264 }
0x18df   :  { %v3430_v2 = vpop.permute.xlu0 %3429 }
0x18e2   :  { %v4732_v26 = vpop.eup %4731 }
0x18e3   :  { %v3183_v28 = vsel %vm3176_vm2, %v4732_v26, 0.0  ;;  %v3595_v41 = vpop.permute.xlu0 %3594 }
0x18e4   :  { %3184 = vadd.xlane.f32.xlu1 %v3183_v28  ;;  %v3970_v28 = vld [vmem:[#allocation2 + $0xf0] ss:$0 sm:$0xff] }
0x18f5   :  { %3596 = vrot.lane.b32.xlu1 %v5277_v34, %s4785_s17 }
0x1971   :  { %v3185_v31 = vpop.xlane.xlu1 %3184 }
0x1972   :  { %4733 = vrcp.f32 %v3185_v31 }
0x1975   :  { %v3597_v39 = vpop.permute.xlu1 %3596 }
0x197c   :  { %v4734_v21 = vpop.eup %4733 }
0x197d   :  { %v3187_v33 = vmul.f32 %v4734_v21, %v4732_v26 }
0x197f   :  { %4389 = vmatmul.mubr.msk.f32.vlgmr.msra.gmra.mrb[32].mxu0 %vm64_vm1, %v3187_v33 }
0x1980   :  { %4392 = vmatpush3.xpose.msk.msra.mxu0 %vm64_vm1, %v3267_v29  ;;  %4393 = vmatprep.mubr.msk.f32.mxu0 %vm4787_vm9, %v4775_v11 }
0x1981   :  { %4401 = vmatprep.subr.mxu0 %v4775_v11 }
0x1983   :  { %4394 = vmatmul.mubr.msk.f32.vlgmr.msra.gmra.mrb[34].mxu0 %vm64_vm1, %v3265_v38 }
0x1984   :  { %4402 = vmatpush3.xpose.msk.msra.mxu0 %vm64_vm1, %v3432_v30  ;;  %4403 = vmatprep.mubr.msk.f32.mxu0 %vm4787_vm9, %v4775_v11  ;;  %v2928_v30 = vadd.f32 %v3970_v28, %v5317_v17 }
0x1985   :  { %4411 = vmatprep.subr.mxu0 %v4775_v11 }
0x1987   :  { %4404 = vmatmul.mubr.msk.f32.vlgmr.msra.gmra.mrb[36].mxu0 %vm64_vm1, %v3430_v2 }
0x1988   :  { %4412 = vmatpush3.xpose.msk.msra.mxu0 %vm64_vm1, %v3597_v39  ;;  %4413 = vmatprep.mubr.msk.f32.mxu0 %vm4787_vm9, %v4775_v11 }
0x1989   :  { %4564 = vmatprep.subr.bf16.mxu0 %v4791_v18 }
0x198b   :  { %4414 = vmatmul.mubr.msk.f32.vlgmr.msra.gmra.mrb[38].mxu0 %vm64_vm1, %v3595_v41  ;;  %v3988_v41 = vld [vmem:[#allocation2 + $0x178] ss:$0 sm:$0xff] }
0x198c   :  { %4429 = vmatprep.mubr.msk.f32.mxu0 %vm4787_vm9, %v4775_v11  ;;  %4566 = vmatpush3.bf16.msra.mxu0 %v4565_v23 }
0x198d   :  { %4567 = vmatprep.subr.bf16.mxu0 %v4791_v18 }
0x1990   :  { %4569 = vmatpush3.bf16.msra.mxu0 %v4568_v25 }
0x1a52   :  { %v5353_v42 = vpop.f32.mrb[32].mxu0 }
0x1a53   :  { %v4390_v43 = vpop.f32.mrb[33].mxu0 }
0x1a56   :  { %v3338_v44 = vpop.f32.mrb[34].mxu0 }
0x1a57   :  { %v3339_v45 = vadd.f32 %v3338_v44, %v3099_v54  ;;  %v4395_v46 = vpop.f32.mrb[35].mxu0 }
0x1a59   :  { %v3342_v47 = vsel %vm3176_vm2, %v3339_v45, -inf }
0x1a5a   :  { %3343 = vmax.xlane.f32.xlu1 %v3342_v47  ;;  %v3503_v27 = vpop.f32.mrb[36].mxu0 }
0x1a5b   :  { %v3504_v48 = vadd.f32 %v3503_v27, %v3099_v54  ;;  %v4405_v16 = vpop.f32.mrb[37].mxu0 }
0x1a5d   :  { %v3507_v37 = vsel %vm3176_vm2, %v3504_v48, -inf }
0x1a5e   :  { %3508 = vmax.xlane.f32.xlu0 %v3507_v37  ;;  %v3668_v22 = vpop.f32.mrb[38].mxu0 }
0x1a5f   :  { %v3669_v49 = vadd.f32 %v3668_v22, %v3099_v54  ;;  %v4415_v50 = vpop.f32.mrb[39].mxu0 }
0x1a61   :  { %v3672_v52 = vsel %vm3176_vm2, %v3669_v49, -inf }
0x1a62   :  { %3673 = vmax.xlane.f32.xlu0 %v3672_v52 }
0x1a6b   :  { %3353 = vrot.lane.b32.xlu1 %v5277_v34, %s4778_s11 }
0x1ae7   :  { %v3344_v57 = vpop.xlane.xlu1 %3343 }
0x1ae8   :  { %v3345_v53 = vsub.f32 %v3339_v45, %v3344_v57 }
0x1aea   :  { %v3346_v58 = vmul.f32 1.442695, %v3345_v53 }
0x1aeb   :  { %v3354_v59 = vpop.permute.xlu1 %3353  ;;  %v3509_v36 = vpop.xlane.xlu0 %3508 }
0x1aec   :  { %4735 = vpow2.f32 %v3346_v58  ;;  %v3510_v10 = vsub.f32 %v3504_v48, %v3509_v36  ;;  %4397 = vmatpush3.msra.mxu1 %v3354_v59 }
0x1aed   :  { %4406 = vmatprep.subr.mxu1 %v4775_v11 }
0x1aee   :  { %v3511_v60 = vmul.f32 1.442695, %v3510_v10 }
0x1aef   :  { %v3674_v61 = vpop.xlane.xlu0 %3673 }
0x1af0   :  { %4737 = vpow2.f32 %v3511_v60  ;;  %v3675_v62 = vsub.f32 %v3669_v49, %v3674_v61 }
0x1af2   :  { %v3676_v0 = vmul.f32 1.442695, %v3675_v62 }
0x1af4   :  { %4739 = vpow2.f32 %v3676_v0 }
0x1af6   :  { %v4736_v1 = vpop.eup %4735 }
0x1af7   :  { %v3348_v9 = vsel %vm3176_vm2, %v4736_v1, 0.0 }
0x1af8   :  { %3349 = vadd.xlane.f32.xlu0 %v3348_v9 }
0x1afa   :  { %v4738_v7 = vpop.eup %4737 }
0x1afb   :  { %v3513_v3 = vsel %vm3176_vm2, %v4738_v7, 0.0 }
0x1afc   :  { %3514 = vadd.xlane.f32.xlu1 %v3513_v3 }
0x1afe   :  { %v4740_v4 = vpop.eup %4739 }
0x1aff   :  { %v3678_v55 = vsel %vm3176_vm2, %v4740_v4, 0.0 }
0x1b00   :  { %3679 = vadd.xlane.f32.xlu0 %v3678_v55 }
0x1b0d   :  { %3683 = vrot.lane.b32.xlu1 %v5277_v34, %s4784_s16 }
0x1b16   :  { %3518 = vrot.lane.b32.xlu0 %v5277_v34, %s4782_s14 }
0x1b85   :  { %v3350_v51 = vpop.xlane.xlu0 %3349 }
0x1b86   :  { %4741 = vrcp.f32 %v3350_v51 }
0x1b89   :  { %v3515_v5 = vpop.xlane.xlu1 %3514 }
0x1b8a   :  { %4743 = vrcp.f32 %v3515_v5 }
0x1b8d   :  { %v3680_v32 = vpop.xlane.xlu0 %3679  ;;  %v3684_v34 = vpop.permute.xlu1 %3683 }
0x1b8e   :  { %4745 = vrcp.f32 %v3680_v32 }
0x1b90   :  { %v4742_v20 = vpop.eup %4741 }
0x1b91   :  { %v3352_v6 = vmul.f32 %v4742_v20, %v4736_v1  ;;  %v3519_v8 = vpop.permute.xlu0 %3518 }
0x1b93   :  { %4399 = vmatmul.mubr.msk.f32.vlgmr.msra.gmra.mrb[36].mxu1 %vm64_vm1, %v3352_v6 }
0x1b94   :  { %v4744_v12 = vpop.eup %4743  ;;  %4407 = vmatpush3.msra.mxu1 %v3519_v8  ;;  %4408 = vmatprep.mubr.msk.f32.mxu1 %vm4787_vm9, %v4775_v11 }
0x1b95   :  { %v3517_v13 = vmul.f32 %v4744_v12, %v4738_v7  ;;  %4416 = vmatprep.subr.mxu1 %v4775_v11 }
0x1b97   :  { %4409 = vmatmul.mubr.msk.f32.vlgmr.msra.gmra.mrb[38].mxu1 %vm64_vm1, %v3517_v13 }
0x1b98   :  { %v4746_v19 = vpop.eup %4745  ;;  %4417 = vmatpush3.msra.mxu1 %v3684_v34  ;;  %4418 = vmatprep.mubr.msk.f32.mxu1 %vm4787_vm9, %v4775_v11  ;;  %vm3868_vm9 = vcmask 778752  }
0x1b99   :  { %v3682_v54 = vmul.f32 %v4746_v19, %v4740_v4 }
0x1b9b   :  { %4419 = vmatmul.mubr.msk.f32.vlgmr.msra.gmra.mrb[40].mxu1 %vm64_vm1, %v3682_v54 }
0x1c66   :  { %v3425_v15 = vpop.f32.mrb[36].mxu1 }
0x1c67   :  { %3760 = vrot.lane.b32.xlu1 %v3425_v15, %s4773_s26  ;;  %v4400_v63 = vpop.f32.mrb[37].mxu1 }
0x1c6a   :  { %v3590_v26 = vpop.f32.mrb[38].mxu1 }
0x1c6b   :  { %3764 = vrot.lane.b32.xlu1 %v3590_v26, %s4789_s23  ;;  %v4410_v11 = vpop.f32.mrb[39].mxu1 }
0x1c6e   :  { %v3755_v29 = vpop.f32.mrb[40].mxu1 }
0x1c6f   :  { %3859 = vrot.lane.b32.xlu1 %v5179_v40, %s4792_s9  ;;  %3768 = vrot.lane.b32.xlu0 %v3755_v29, %s4790_s24  ;;  %v4420_v18 = vpop.f32.mrb[41].mxu1 }
0x1c73   :  { %3865 = vrot.lane.b32.xlu0 %v2928_v30, %s4777_s10 }
0x1cd9   :  { %v3761_v31 = vpop.permute.xlu1 %3760 }
0x1cda   :  { %v3771_v33 = vsel %vm64_vm1, %v5353_v42, %v3761_v31  ;;  %vm3874_vm1 = vcmask 1041152  }
0x1cdd   :  { %v3765_v21 = vpop.permute.xlu1 %3764 }
0x1cde   :  { %v3772_v38 = vsel %vm982_vm12, %v3771_v33, %v3765_v21 }
0x1ce1   :  { %v3860_v2 = vpop.permute.xlu1 %3859  ;;  %v3769_v39 = vpop.permute.xlu0 %3768 }
0x1ce2   :  { %3863 = vst.msk [vmem:[%s5412_s4] sm:$0xf] %vm3862_vm5, %v3860_v2  ;;  %v3773_v40 = vsel %vm985_vm11, %v3772_v38, %v3769_v39  ;;  %vm3884_vm11 = vcmask 1042177  }
0x1ce3   :  { %3992 = vst.msk [vmem:[%s5412_s4 + $0x4] sm:$0xf0] %vm3880_vm8, %v3860_v2  ;;  %4430 = vmatmul.mubr.msk.f32.vlgmr.msra.gmra.mrb[40].mxu0 %vm997_vm13, %v3773_v40 }
0x1ce5   :  { %v3866_v17 = vpop.permute.xlu0 %3865 }
0x1ce6   :  { %3869 = vst.msk [vmem:[%s5412_s4] sm:$0x1] %vm3868_vm9, %v3866_v17 }
0x1ce7   :  { %3993 = vst.msk [vmem:[%s5412_s4 + $0x7] sm:$0x2] %vm3882_vm10, %v3866_v17 }
0x1db6   :  { %v3852_v42 = vpop.f32.mrb[40].mxu0 }
0x1db7   :  { %v3853_v43 = vadd.f32 %v3988_v41, %v3852_v42  ;;  %v4431_v44 = vpop.f32.mrb[41].mxu0 }
0x1db9   :  { %3871 = vrot.lane.b32.xlu1 %v3853_v43, %s4774_s0 }
0x1e2b   :  { %v3872_v45 = vpop.permute.xlu1 %3871 }
0x1e2c   :  { %3875 = vst.msk [vmem:[%s5412_s4] sm:$0x1] %vm3874_vm1, %v3872_v45 }
0x1e2d   :  { %3994 = vst.msk [vmem:[%s5412_s4 + $0x7] sm:$0x2] %vm3884_vm11, %v3872_v45 }
0x1e2e   :  { %3890 = vsyncpa [#allocation3], 1 }

</bundles_post_ra>
